<compile_context>
chip_gen: v7x
topology: tpu7x:2x2x1
jax: 0.10.0
libtpu: 0.0.40
codegen_flags: <defaults>
</compile_context>

<pallas_src>
import functools
import math

import jax
import jax.numpy as jnp
from jax.experimental import pallas as pl
from jax.experimental.pallas import tpu as pltpu


def _round_up(v, m):
    return ((v + m - 1) // m) * m


def hgnn_att_kernel(x0_ref, g_ref, gt_ref, w_ref, v_ref,
                    out_x_ref, out_e_ref, x_carry, *, d_valid):
    step = pl.program_id(0)

    @pl.when(step == 0)
    def _init():
        x_carry[...] = x0_ref[...]

    x_in = x_carry[...]                          # (N, Dp) carried embedding
    # bf16 -> f32 casts are exact for 0/1 incidence entries (VPU cast).
    G = g_ref[...].astype(jnp.float32)           # (N, E)
    GT = gt_ref[...].astype(jnp.float32)         # (E, N) precomputed transpose
    N, Dp = x_in.shape

    def vec(i):                                  # (1, Dp) row of vector slab
        return v_ref[pl.ds(i, 1), :]

    def hgnn_conv(h, k):
        # x = x @ W + b ; edge = (G^T @ x) @ W1 ; x = G @ edge
        W = w_ref[2 * k]
        W1 = w_ref[2 * k + 1]
        b = vec(k)
        h = jnp.dot(h, W, preferred_element_type=jnp.float32) + b
        edge = jnp.dot(GT, h, preferred_element_type=jnp.float32)   # (E, Dp)
        edge = jnp.dot(edge, W1, preferred_element_type=jnp.float32)
        h = jnp.dot(G, edge, preferred_element_type=jnp.float32)    # (N, Dp)
        return h, edge

    # ---- HGNNLayer ----
    h, _ = hgnn_conv(x_in, 0)
    h, _ = hgnn_conv(h, 1)
    # softmax over the feature axis (dim=1), restricted to the d_valid real
    # lanes (padded lanes are exactly zero before and after this block).
    lane = jax.lax.broadcasted_iota(jnp.int32, h.shape, dimension=1)
    h = jnp.where(lane < d_valid, h, -1e30)
    m = jnp.max(h, axis=1, keepdims=True)
    e = jnp.exp(h - m)
    h = e / jnp.sum(e, axis=1, keepdims=True)    # exact reciprocal
    h, edge = hgnn_conv(h, 2)
    node = jnp.tanh(h)                           # F.dropout -> identity (eval)

    # ---- F.dropout -> identity; BatchNorm1d (eval) scale/shift pre-folded ----
    scale = vec(3)
    shift = vec(4)
    node_bn = node * scale + shift                                   # (N, Dp)
    edge_bn = edge * scale + shift                                   # (E, Dp)

    # ---- Fusion(hidden=x_in, dy_emb=node_bn) ----
    # linear2 bias shifts both dim-0 softmax logits equally -> no-op; dropped.
    wl1 = w_ref[6]                               # (Dp, Dp) fusion linear1
    bl1 = vec(5)
    w2 = vec(6)                                  # (1, Dp) linear2 weight row
    if N >= 128:
        # MXU M dim already full: skip the concat copy (review item #10).
        t0 = jnp.tanh(jnp.dot(x_in, wl1, preferred_element_type=jnp.float32) + bl1)
        t1 = jnp.tanh(jnp.dot(node_bn, wl1, preferred_element_type=jnp.float32) + bl1)
        s0 = jnp.sum(t0 * w2, axis=1, keepdims=True)                 # VPU+XLU
        s1 = jnp.sum(t1 * w2, axis=1, keepdims=True)
    else:
        emb2 = jnp.concatenate([x_in, node_bn], axis=0)              # (2N, Dp)
        t = jnp.tanh(jnp.dot(emb2, wl1, preferred_element_type=jnp.float32) + bl1)
        sc = jnp.sum(t * w2, axis=1, keepdims=True)                  # VPU+XLU
        s0, s1 = sc[:N], sc[N:]
    sm = jnp.maximum(s0, s1)
    e0 = jnp.exp(s0 - sm)
    e1 = jnp.exp(s1 - sm)
    inv = 1.0 / (e0 + e1)                        # exact reciprocal
    new_x = (e0 * inv) * x_in + (e1 * inv) * node_bn

    out_x_ref[0] = new_x
    out_e_ref[0] = edge_bn
    x_carry[...] = new_x                         # carry to the next sub-graph


@functools.partial(jax.jit, static_argnames=("d_valid",))
def _hgnn_att_fused(x, Gs, w_slab, v_slab, *, d_valid):
    """All sub-hypergraphs in one pallas_call; returns ((S,N,Dp), (S,E,Dp))."""
    S, N, E = Gs.shape
    Dp = x.shape[1]
    GTs = jnp.swapaxes(Gs, 1, 2)                 # (S, E, N) bf16, one-time
    kernel = functools.partial(hgnn_att_kernel, d_valid=d_valid)
    return pl.pallas_call(
        kernel,
        out_shape=(jax.ShapeDtypeStruct((S, N, Dp), jnp.float32),
                   jax.ShapeDtypeStruct((S, E, Dp), jnp.float32)),
        grid=(S,),
        in_specs=[
            pl.BlockSpec((N, Dp), lambda s: (0, 0)),           # x0 (resident)
            pl.BlockSpec((None, N, E), lambda s: (s, 0, 0)),   # G_s   (bf16)
            pl.BlockSpec((None, E, N), lambda s: (s, 0, 0)),   # G_s^T (bf16)
            pl.BlockSpec((7, Dp, Dp), lambda s: (0, 0, 0)),    # weight slab
            pl.BlockSpec((8, Dp), lambda s: (0, 0)),           # vector slab
        ],
        out_specs=(pl.BlockSpec((1, N, Dp), lambda s: (s, 0, 0)),
                   pl.BlockSpec((1, E, Dp), lambda s: (s, 0, 0))),
        scratch_shapes=[pltpu.VMEM((N, Dp), jnp.float32)],     # x carry
        compiler_params=pltpu.CompilerParams(
            # The x-carry is a serial dependency across the S axis: it MUST
            # stay "arbitrary" (never "parallel"/core-parallel).
            dimension_semantics=("arbitrary",),
            vmem_limit_bytes=48 * 1024 * 1024),                # v7x: 64 MiB phys
    )(x, Gs, GTs, w_slab, v_slab)


def _pack_params(p, D, Dp):
    """Pack parameters into a (7,Dp,Dp) weight slab and an (8,Dp) vector slab,
    zero-padded from D to Dp lanes (padding keeps all padded outputs == 0)."""
    def padm(a):
        return jnp.zeros((Dp, Dp), jnp.float32).at[:D, :D].set(a)

    def padv(a):
        return jnp.zeros((1, Dp), jnp.float32).at[:, :D].set(a)

    w_slab = jnp.stack([padm(p["hgc1_w"]), padm(p["hgc1_w1"]),
                        padm(p["hgc2_w"]), padm(p["hgc2_w1"]),
                        padm(p["hgc3_w"]), padm(p["hgc3_w1"]),
                        padm(p["fus_l1_w"])], axis=0)            # (7, Dp, Dp)
    scale = p["bn_gamma"] / jnp.sqrt(p["bn_var"] + 1e-5)
    shift = p["bn_beta"] - p["bn_mean"] * scale
    v_slab = jnp.concatenate(
        [padv(p["hgc1_b"]), padv(p["hgc2_b"]), padv(p["hgc3_b"]),
         padv(scale), padv(shift), padv(p["fus_l1_b"]),
         padv(p["fus_l2_w"]), jnp.zeros((1, Dp), jnp.float32)],
        axis=0)                                                  # (8, Dp)
    return w_slab, v_slab


def hgnn_att_forward(x, hypergraph_dict, root_idx, params):
    # root_emb = F.embedding(root_idx, x) is computed-but-unused in the
    # original forward; dropped here (root_idx is ignored).
    del root_idx
    keys = list(hypergraph_dict.keys())          # explicit insertion order
    N, D = x.shape
    Dp = max(_round_up(D, 128), 128)             # lane-dense feature axis
    # bf16 storage of 0/1 incidence matrices is bit-exact and halves DMA bytes.
    Gs = jnp.stack([hypergraph_dict[k] for k in keys], axis=0).astype(jnp.bfloat16)
    x_pad = jnp.zeros((N, Dp), jnp.float32).at[:, :D].set(x)
    w_slab, v_slab = _pack_params(params, D, Dp)
    out_x, out_edge = _hgnn_att_fused(x_pad, Gs, w_slab, v_slab, d_valid=D)
    out_x = out_x[:, :, :D]                      # slice padding back on host
    out_edge = out_edge[:, :, :D]
    embedding_list = {}
    xl = x
    for i, k in enumerate(keys):
        embedding_list[k] = (out_x[i], out_edge[i], xl)
        xl = out_x[i]
    return embedding_list


# -------------------- parameter init & pure-JAX reference --------------------

def init_params(key, D):
    ks = jax.random.split(key, 16)
    stdv = 1.0 / math.sqrt(D)

    def unif(k, shape):
        return jax.random.uniform(k, shape, jnp.float32, -stdv, stdv)

    p = {}
    i = 0
    for name in ("hgc1", "hgc2", "hgc3"):
        p[f"{name}_w"] = unif(ks[i], (D, D)); i += 1
        p[f"{name}_w1"] = unif(ks[i], (D, D)); i += 1
        p[f"{name}_b"] = unif(ks[i], (1, D)); i += 1
    # BatchNorm1d defaults (eval mode => identity affine)
    p["bn_gamma"] = jnp.ones((1, D), jnp.float32)
    p["bn_beta"] = jnp.zeros((1, D), jnp.float32)
    p["bn_mean"] = jnp.zeros((1, D), jnp.float32)
    p["bn_var"] = jnp.ones((1, D), jnp.float32)
    # Fusion: xavier_normal_ weights, default uniform biases.
    xn1 = math.sqrt(2.0 / (D + D))
    p["fus_l1_w"] = jax.random.normal(ks[i], (D, D), jnp.float32) * xn1; i += 1
    p["fus_l1_b"] = unif(ks[i], (1, D)); i += 1
    xn2 = math.sqrt(2.0 / (D + 1))
    p["fus_l2_w"] = jax.random.normal(ks[i], (1, D), jnp.float32) * xn2; i += 1
    p["fus_l2_b"] = jax.random.uniform(ks[i], (1, 1), jnp.float32, -stdv, stdv)
    return p


_HI = jax.lax.Precision.HIGHEST


def ref_step(x, G, p):
    """Pure-JAX reference with HIGHEST-precision matmuls (so the check is not
    polluted by XLA's default bf16-pass f32 dot on TPU)."""
    def mm(a, b):
        return jnp.dot(a, b, precision=_HI)

    def conv(h, W, W1, b):
        h = mm(h, W) + b
        edge = mm(G.T, h)
        edge = mm(edge, W1)
        return mm(G, edge), edge

    h, _ = conv(x, p["hgc1_w"], p["hgc1_w1"], p["hgc1_b"])
    h, _ = conv(h, p["hgc2_w"], p["hgc2_w1"], p["hgc2_b"])
    h = jax.nn.softmax(h, axis=1)
    h, edge = conv(h, p["hgc3_w"], p["hgc3_w1"], p["hgc3_b"])
    node = jnp.tanh(h)
    scale = p["bn_gamma"] / jnp.sqrt(p["bn_var"] + 1e-5)
    shift = p["bn_beta"] - p["bn_mean"] * scale
    node_bn = node * scale + shift
    edge_bn = edge * scale + shift
    emb = jnp.stack([x, node_bn], axis=0)
    t = jnp.tanh(mm(emb, p["fus_l1_w"]) + p["fus_l1_b"])
    s = jnp.sum(t * p["fus_l2_w"], axis=-1, keepdims=True) + p["fus_l2_b"]
    a = jax.nn.softmax(s, axis=0)
    return jnp.sum(a * emb, axis=0), edge_bn


if __name__ == "__main__":
    N, E, D = 64, 16, 32          # nodes, hyperedges, emb_dim (input==output)
    key = jax.random.PRNGKey(0)
    kx, kg1, kg2, kg3, kp = jax.random.split(key, 5)

    x = jax.random.normal(kx, (N, D), jnp.float32)
    # binary incidence matrices for three sub-hypergraphs (same N, E)
    hypergraphs = {
        "sub0": (jax.random.uniform(kg1, (N, E)) < 0.3).astype(jnp.float32),
        "sub1": (jax.random.uniform(kg2, (N, E)) < 0.3).astype(jnp.float32),
        "sub2": (jax.random.uniform(kg3, (N, E)) < 0.3).astype(jnp.float32),
    }
    params = init_params(kp, D)

    out = hgnn_att_forward(x, hypergraphs, None, params)
    jax.block_until_ready(out)

    # per-step check vs. a pure-JAX reference (fed with the kernel's carried
    # input xl for each step, so the check isolates single-step semantics).
    # Tolerance 2e-3 covers MXU pass-count / exp / tanh implementation deltas
    # between Mosaic and XLA; a real bug produces O(0.1-1) errors.
    prev = x
    for k in ("sub0", "sub1", "sub2"):
        got_x, got_edge, got_xl = out[k]
        assert jnp.allclose(got_xl, prev, atol=1e-6), "carry (xl) mismatch"
        ref_x, ref_edge = ref_step(got_xl, hypergraphs[k], params)
        assert jnp.allclose(got_x, ref_x, atol=2e-3, rtol=2e-3), "node mismatch"
        assert jnp.allclose(got_edge, ref_edge, atol=2e-3, rtol=2e-3), "edge mismatch"
        prev = got_x

    print("KERNEL_OK")
</pallas_src>

<mosaic_0001>
module attributes {stable_mosaic.version = 11 : i64} {
  func.func @hgnn_att_kernel(%arg0: i32, %arg1: memref<64x128xf32, #tpu.memory_space<vmem>>, %arg2: memref<1x64x16xbf16, #tpu.memory_space<vmem>>, %arg3: memref<1x16x64xbf16, #tpu.memory_space<vmem>>, %arg4: memref<7x128x128xf32, #tpu.memory_space<vmem>>, %arg5: memref<8x128xf32, #tpu.memory_space<vmem>>, %arg6: memref<1x64x128xf32, #tpu.memory_space<vmem>>, %arg7: memref<1x16x128xf32, #tpu.memory_space<vmem>>, %arg8: memref<64x128xf32, #tpu.memory_space<vmem>>) attributes {dimension_semantics = [#tpu.dimension_semantics<arbitrary>], iteration_bounds = array<i64: 3>, scalar_prefetch = 0 : i64, scratch_operands = 1 : i64, tpu.core_type = #tpu.core_type<tc>, window_params = [{pipeline_mode = #tpu.pipeline_mode<synchronous>, transform_indices = @transform_0, window_bounds = array<i64: 64, 128>}, {transform_indices = @transform_1, window_bounds = array<i64: 1, 64, 16>}, {transform_indices = @transform_2, window_bounds = array<i64: 1, 16, 64>}, {pipeline_mode = #tpu.pipeline_mode<synchronous>, transform_indices = @transform_3, window_bounds = array<i64: 7, 128, 128>}, {pipeline_mode = #tpu.pipeline_mode<synchronous>, transform_indices = @transform_4, window_bounds = array<i64: 8, 128>}, {transform_indices = @transform_5, window_bounds = array<i64: 1, 64, 128>}, {transform_indices = @transform_6, window_bounds = array<i64: 1, 16, 128>}]} {
    %c0_i32 = arith.constant 0 : i32
    %0 = arith.cmpi eq, %arg0, %c0_i32 : i32
    %1 = arith.extui %0 : i1 to i32
    %c0_i32_0 = arith.constant 0 : i32
    %2 = arith.cmpi ne, %1, %c0_i32_0 : i32
    scf.if %2 {
      %c0_62 = arith.constant 0 : index
      %c0_63 = arith.constant 0 : index
      %105 = vector.load %arg1[%c0_62, %c0_63] : memref<64x128xf32, #tpu.memory_space<vmem>>, vector<64x128xf32>
      %c0_64 = arith.constant 0 : index
      %c0_65 = arith.constant 0 : index
      %106 = vector.load %arg8[%c0_64, %c0_65] : memref<64x128xf32, #tpu.memory_space<vmem>>, vector<64x128xf32>
      tpu.vector_store %arg8[%c0_64, %c0_65], %105 {strides = array<i32>} : memref<64x128xf32, #tpu.memory_space<vmem>>, vector<64x128xf32>,
    } else {
    }
    %c0 = arith.constant 0 : index
    %c0_1 = arith.constant 0 : index
    %3 = vector.load %arg8[%c0, %c0_1] : memref<64x128xf32, #tpu.memory_space<vmem>>, vector<64x128xf32>
    %c0_2 = arith.constant 0 : index
    %c0_3 = arith.constant 0 : index
    %c0_4 = arith.constant 0 : index
    %4 = vector.load %arg2[%c0_2, %c0_3, %c0_4] : memref<1x64x16xbf16, #tpu.memory_space<vmem>>, vector<1x64x16xbf16>
    %5 = vector.shape_cast %4 : vector<1x64x16xbf16> to vector<64x16xbf16>
    %6 = arith.extf %5 : vector<64x16xbf16> to vector<64x16xf32>
    %c0_5 = arith.constant 0 : index
    %c0_6 = arith.constant 0 : index
    %c0_7 = arith.constant 0 : index
    %7 = vector.load %arg3[%c0_5, %c0_6, %c0_7] : memref<1x16x64xbf16, #tpu.memory_space<vmem>>, vector<1x16x64xbf16>
    %8 = vector.shape_cast %7 : vector<1x16x64xbf16> to vector<16x64xbf16>
    %9 = arith.extf %8 : vector<16x64xbf16> to vector<16x64xf32>
    %c0_8 = arith.constant 0 : index
    %c0_9 = arith.constant 0 : index
    %c0_10 = arith.constant 0 : index
    %10 = vector.load %arg4[%c0_8, %c0_9, %c0_10] : memref<7x128x128xf32, #tpu.memory_space<vmem>>, vector<1x128x128xf32>
    %11 = vector.shape_cast %10 : vector<1x128x128xf32> to vector<128x128xf32>
    %c1 = arith.constant 1 : index
    %c0_11 = arith.constant 0 : index
    %c0_12 = arith.constant 0 : index
    %12 = vector.load %arg4[%c1, %c0_11, %c0_12] : memref<7x128x128xf32, #tpu.memory_space<vmem>>, vector<1x128x128xf32>
    %13 = vector.shape_cast %12 : vector<1x128x128xf32> to vector<128x128xf32>
    %c0_13 = arith.constant 0 : index
    %c0_14 = arith.constant 0 : index
    %14 = vector.load %arg5[%c0_13, %c0_14] : memref<8x128xf32, #tpu.memory_space<vmem>>, vector<1x128xf32>
    %cst = arith.constant dense<0.000000e+00> : vector<64x128xf32>
    %15 = tpu.matmul %3, %11, %cst {dimension_numbers = #tpu.dot_dimension_numbers<[1], [0], [0], [1], [0, 0, 1, 1], [], []>} : vector<64x128xf32>, vector<128x128xf32>, vector<64x128xf32> -> vector<64x128xf32>
    %16 = vector.broadcast %14 : vector<1x128xf32> to vector<64x128xf32>
    %17 = arith.addf %15, %16 : vector<64x128xf32>
    %cst_15 = arith.constant dense<0.000000e+00> : vector<16x128xf32>
    %18 = tpu.matmul %9, %17, %cst_15 {dimension_numbers = #tpu.dot_dimension_numbers<[1], [0], [0], [1], [0, 0, 1, 1], [], []>} : vector<16x64xf32>, vector<64x128xf32>, vector<16x128xf32> -> vector<16x128xf32>
    %cst_16 = arith.constant dense<0.000000e+00> : vector<16x128xf32>
    %19 = tpu.matmul %18, %13, %cst_16 {dimension_numbers = #tpu.dot_dimension_numbers<[1], [0], [0], [1], [0, 0, 1, 1], [], []>} : vector<16x128xf32>, vector<128x128xf32>, vector<16x128xf32> -> vector<16x128xf32>
    %cst_17 = arith.constant dense<0.000000e+00> : vector<64x128xf32>
    %20 = tpu.matmul %6, %19, %cst_17 {dimension_numbers = #tpu.dot_dimension_numbers<[1], [0], [0], [1], [0, 0, 1, 1], [], []>} : vector<64x16xf32>, vector<16x128xf32>, vector<64x128xf32> -> vector<64x128xf32>
    %c2 = arith.constant 2 : index
    %c0_18 = arith.constant 0 : index
    %c0_19 = arith.constant 0 : index
    %21 = vector.load %arg4[%c2, %c0_18, %c0_19] : memref<7x128x128xf32, #tpu.memory_space<vmem>>, vector<1x128x128xf32>
    %22 = vector.shape_cast %21 : vector<1x128x128xf32> to vector<128x128xf32>
    %c3 = arith.constant 3 : index
    %c0_20 = arith.constant 0 : index
    %c0_21 = arith.constant 0 : index
    %23 = vector.load %arg4[%c3, %c0_20, %c0_21] : memref<7x128x128xf32, #tpu.memory_space<vmem>>, vector<1x128x128xf32>
    %24 = vector.shape_cast %23 : vector<1x128x128xf32> to vector<128x128xf32>
    %c1_22 = arith.constant 1 : index
    %c0_23 = arith.constant 0 : index
    %25 = vector.load %arg5[%c1_22, %c0_23] : memref<8x128xf32, #tpu.memory_space<vmem>>, vector<1x128xf32>
    %cst_24 = arith.constant dense<0.000000e+00> : vector<64x128xf32>
    %26 = tpu.matmul %20, %22, %cst_24 {dimension_numbers = #tpu.dot_dimension_numbers<[1], [0], [0], [1], [0, 0, 1, 1], [], []>} : vector<64x128xf32>, vector<128x128xf32>, vector<64x128xf32> -> vector<64x128xf32>
    %27 = vector.broadcast %25 : vector<1x128xf32> to vector<64x128xf32>
    %28 = arith.addf %26, %27 : vector<64x128xf32>
    %cst_25 = arith.constant dense<0.000000e+00> : vector<16x128xf32>
    %29 = tpu.matmul %9, %28, %cst_25 {dimension_numbers = #tpu.dot_dimension_numbers<[1], [0], [0], [1], [0, 0, 1, 1], [], []>} : vector<16x64xf32>, vector<64x128xf32>, vector<16x128xf32> -> vector<16x128xf32>
    %cst_26 = arith.constant dense<0.000000e+00> : vector<16x128xf32>
    %30 = tpu.matmul %29, %24, %cst_26 {dimension_numbers = #tpu.dot_dimension_numbers<[1], [0], [0], [1], [0, 0, 1, 1], [], []>} : vector<16x128xf32>, vector<128x128xf32>, vector<16x128xf32> -> vector<16x128xf32>
    %cst_27 = arith.constant dense<0.000000e+00> : vector<64x128xf32>
    %31 = tpu.matmul %6, %30, %cst_27 {dimension_numbers = #tpu.dot_dimension_numbers<[1], [0], [0], [1], [0, 0, 1, 1], [], []>} : vector<64x16xf32>, vector<16x128xf32>, vector<64x128xf32> -> vector<64x128xf32>
    %32 = tpu.iota {dimensions = array<i32: 1>} : vector<64x128xi32>
    %c32_i32 = arith.constant 32 : i32
    %33 = vector.broadcast %c32_i32 : i32 to vector<64x128xi32>
    %34 = arith.cmpi slt, %32, %33 : vector<64x128xi32>
    %cst_28 = arith.constant -1.000000e+30 : f32
    %35 = vector.broadcast %cst_28 : f32 to vector<64x128xf32>
    %36 = arith.select %34, %31, %35 : vector<64x128xi1>, vector<64x128xf32>
    %cst_29 = arith.constant dense<0xFF800000> : vector<64xf32>
    %37 = vector.multi_reduction <maximumf>, %36, %cst_29 [1] : vector<64x128xf32> to vector<64xf32>
    %38 = vector.shape_cast %37 : vector<64xf32> to vector<64x1xf32>
    %39 = vector.broadcast %38 : vector<64x1xf32> to vector<64x128xf32>
    %40 = arith.subf %36, %39 : vector<64x128xf32>
    %41 = math.exp %40 : vector<64x128xf32>
    %cst_30 = arith.constant dense<0.000000e+00> : vector<64xf32>
    %42 = vector.multi_reduction <add>, %41, %cst_30 [1] : vector<64x128xf32> to vector<64xf32>
    %43 = vector.shape_cast %42 : vector<64xf32> to vector<64x1xf32>
    %44 = vector.broadcast %43 : vector<64x1xf32> to vector<64x128xf32>
    %45 = arith.divf %41, %44 : vector<64x128xf32>
    %c4 = arith.constant 4 : index
    %c0_31 = arith.constant 0 : index
    %c0_32 = arith.constant 0 : index
    %46 = vector.load %arg4[%c4, %c0_31, %c0_32] : memref<7x128x128xf32, #tpu.memory_space<vmem>>, vector<1x128x128xf32>
    %47 = vector.shape_cast %46 : vector<1x128x128xf32> to vector<128x128xf32>
    %c5 = arith.constant 5 : index
    %c0_33 = arith.constant 0 : index
    %c0_34 = arith.constant 0 : index
    %48 = vector.load %arg4[%c5, %c0_33, %c0_34] : memref<7x128x128xf32, #tpu.memory_space<vmem>>, vector<1x128x128xf32>
    %49 = vector.shape_cast %48 : vector<1x128x128xf32> to vector<128x128xf32>
    %c2_35 = arith.constant 2 : index
    %c0_36 = arith.constant 0 : index
    %50 = vector.load %arg5[%c2_35, %c0_36] : memref<8x128xf32, #tpu.memory_space<vmem>>, vector<1x128xf32>
    %cst_37 = arith.constant dense<0.000000e+00> : vector<64x128xf32>
    %51 = tpu.matmul %45, %47, %cst_37 {dimension_numbers = #tpu.dot_dimension_numbers<[1], [0], [0], [1], [0, 0, 1, 1], [], []>} : vector<64x128xf32>, vector<128x128xf32>, vector<64x128xf32> -> vector<64x128xf32>
    %52 = vector.broadcast %50 : vector<1x128xf32> to vector<64x128xf32>
    %53 = arith.addf %51, %52 : vector<64x128xf32>
    %cst_38 = arith.constant dense<0.000000e+00> : vector<16x128xf32>
    %54 = tpu.matmul %9, %53, %cst_38 {dimension_numbers = #tpu.dot_dimension_numbers<[1], [0], [0], [1], [0, 0, 1, 1], [], []>} : vector<16x64xf32>, vector<64x128xf32>, vector<16x128xf32> -> vector<16x128xf32>
    %cst_39 = arith.constant dense<0.000000e+00> : vector<16x128xf32>
    %55 = tpu.matmul %54, %49, %cst_39 {dimension_numbers = #tpu.dot_dimension_numbers<[1], [0], [0], [1], [0, 0, 1, 1], [], []>} : vector<16x128xf32>, vector<128x128xf32>, vector<16x128xf32> -> vector<16x128xf32>
    %cst_40 = arith.constant dense<0.000000e+00> : vector<64x128xf32>
    %56 = tpu.matmul %6, %55, %cst_40 {dimension_numbers = #tpu.dot_dimension_numbers<[1], [0], [0], [1], [0, 0, 1, 1], [], []>} : vector<64x16xf32>, vector<16x128xf32>, vector<64x128xf32> -> vector<64x128xf32>
    %57 = math.tanh %56 : vector<64x128xf32>
    %c3_41 = arith.constant 3 : index
    %c0_42 = arith.constant 0 : index
    %58 = vector.load %arg5[%c3_41, %c0_42] : memref<8x128xf32, #tpu.memory_space<vmem>>, vector<1x128xf32>
    %c4_43 = arith.constant 4 : index
    %c0_44 = arith.constant 0 : index
    %59 = vector.load %arg5[%c4_43, %c0_44] : memref<8x128xf32, #tpu.memory_space<vmem>>, vector<1x128xf32>
    %60 = vector.broadcast %58 : vector<1x128xf32> to vector<64x128xf32>
    %61 = arith.mulf %57, %60 : vector<64x128xf32>
    %62 = vector.broadcast %59 : vector<1x128xf32> to vector<64x128xf32>
    %63 = arith.addf %61, %62 : vector<64x128xf32>
    %64 = vector.broadcast %58 : vector<1x128xf32> to vector<16x128xf32>
    %65 = arith.mulf %55, %64 : vector<16x128xf32>
    %66 = vector.broadcast %59 : vector<1x128xf32> to vector<16x128xf32>
    %67 = arith.addf %65, %66 : vector<16x128xf32>
    %c6 = arith.constant 6 : index
    %c0_45 = arith.constant 0 : index
    %c0_46 = arith.constant 0 : index
    %68 = vector.load %arg4[%c6, %c0_45, %c0_46] : memref<7x128x128xf32, #tpu.memory_space<vmem>>, vector<1x128x128xf32>
    %69 = vector.shape_cast %68 : vector<1x128x128xf32> to vector<128x128xf32>
    %c5_47 = arith.constant 5 : index
    %c0_48 = arith.constant 0 : index
    %70 = vector.load %arg5[%c5_47, %c0_48] : memref<8x128xf32, #tpu.memory_space<vmem>>, vector<1x128xf32>
    %c6_49 = arith.constant 6 : index
    %c0_50 = arith.constant 0 : index
    %71 = vector.load %arg5[%c6_49, %c0_50] : memref<8x128xf32, #tpu.memory_space<vmem>>, vector<1x128xf32>
    %72 = tpu.concatenate %3, %63 in 0 : vector<64x128xf32>, vector<64x128xf32> -> vector<128x128xf32>
    %cst_51 = arith.constant dense<0.000000e+00> : vector<128x128xf32>
    %73 = tpu.matmul %72, %69, %cst_51 {dimension_numbers = #tpu.dot_dimension_numbers<[1], [0], [0], [1], [0, 0, 1, 1], [], []>} : vector<128x128xf32>, vector<128x128xf32>, vector<128x128xf32> -> vector<128x128xf32>
    %74 = vector.broadcast %70 : vector<1x128xf32> to vector<128x128xf32>
    %75 = arith.addf %73, %74 : vector<128x128xf32>
    %76 = math.tanh %75 : vector<128x128xf32>
    %77 = vector.broadcast %71 : vector<1x128xf32> to vector<128x128xf32>
    %78 = arith.mulf %76, %77 : vector<128x128xf32>
    %cst_52 = arith.constant dense<0.000000e+00> : vector<128xf32>
    %79 = vector.multi_reduction <add>, %78, %cst_52 [1] : vector<128x128xf32> to vector<128xf32>
    %80 = vector.shape_cast %79 : vector<128xf32> to vector<128x1xf32>
    %81 = vector.extract_strided_slice %80 {offsets = [0, 0], sizes = [64, 1], strides = [1, 1]} : vector<128x1xf32> to vector<64x1xf32>
    %82 = vector.extract_strided_slice %80 {offsets = [64, 0], sizes = [64, 1], strides = [1, 1]} : vector<128x1xf32> to vector<64x1xf32>
    %83 = arith.maximumf %81, %82 : vector<64x1xf32>
    %84 = arith.subf %81, %83 : vector<64x1xf32>
    %85 = math.exp %84 : vector<64x1xf32>
    %86 = arith.subf %82, %83 : vector<64x1xf32>
    %87 = math.exp %86 : vector<64x1xf32>
    %88 = arith.addf %85, %87 : vector<64x1xf32>
    %cst_53 = arith.constant 1.000000e+00 : f32
    %89 = vector.broadcast %cst_53 : f32 to vector<64x1xf32>
    %90 = arith.divf %89, %88 : vector<64x1xf32>
    %91 = arith.mulf %85, %90 : vector<64x1xf32>
    %92 = vector.broadcast %91 : vector<64x1xf32> to vector<64x128xf32>
    %93 = arith.mulf %92, %3 : vector<64x128xf32>
    %94 = arith.mulf %87, %90 : vector<64x1xf32>
    %95 = vector.broadcast %94 : vector<64x1xf32> to vector<64x128xf32>
    %96 = arith.mulf %95, %63 : vector<64x128xf32>
    %97 = arith.addf %93, %96 : vector<64x128xf32>
    %c0_54 = arith.constant 0 : index
    %c0_55 = arith.constant 0 : index
    %c0_56 = arith.constant 0 : index
    %98 = vector.load %arg6[%c0_54, %c0_55, %c0_56] : memref<1x64x128xf32, #tpu.memory_space<vmem>>, vector<1x64x128xf32>
    %99 = vector.shape_cast %98 : vector<1x64x128xf32> to vector<64x128xf32>
    %100 = vector.shape_cast %97 : vector<64x128xf32> to vector<1x64x128xf32>
    tpu.vector_store %arg6[%c0_54, %c0_55, %c0_56], %100 {strides = array<i32>} : memref<1x64x128xf32, #tpu.memory_space<vmem>>, vector<1x64x128xf32>,
    %c0_57 = arith.constant 0 : index
    %c0_58 = arith.constant 0 : index
    %c0_59 = arith.constant 0 : index
    %101 = vector.load %arg7[%c0_57, %c0_58, %c0_59] : memref<1x16x128xf32, #tpu.memory_space<vmem>>, vector<1x16x128xf32>
    %102 = vector.shape_cast %101 : vector<1x16x128xf32> to vector<16x128xf32>
    %103 = vector.shape_cast %67 : vector<16x128xf32> to vector<1x16x128xf32>
    tpu.vector_store %arg7[%c0_57, %c0_58, %c0_59], %103 {strides = array<i32>} : memref<1x16x128xf32, #tpu.memory_space<vmem>>, vector<1x16x128xf32>,
    %c0_60 = arith.constant 0 : index
    %c0_61 = arith.constant 0 : index
    %104 = vector.load %arg8[%c0_60, %c0_61] : memref<64x128xf32, #tpu.memory_space<vmem>>, vector<64x128xf32>
    tpu.vector_store %arg8[%c0_60, %c0_61], %97 {strides = array<i32>} : memref<64x128xf32, #tpu.memory_space<vmem>>, vector<64x128xf32>,
    return
  }
  func.func @transform_0(%arg0: i32) -> (i32, i32) {
    %c0_i32 = arith.constant 0 : i32
    %c0_i32_0 = arith.constant 0 : i32
    %c0_i32_1 = arith.constant 0 : i32
    return %c0_i32, %c0_i32_0 : i32, i32
  }
  func.func @transform_1(%arg0: i32) -> (i32, i32, i32) {
    %c0_i32 = arith.constant 0 : i32
    %c0_i32_0 = arith.constant 0 : i32
    %c0_i32_1 = arith.constant 0 : i32
    return %arg0, %c0_i32, %c0_i32_0 : i32, i32, i32
  }
  func.func @transform_2(%arg0: i32) -> (i32, i32, i32) {
    %c0_i32 = arith.constant 0 : i32
    %c0_i32_0 = arith.constant 0 : i32
    %c0_i32_1 = arith.constant 0 : i32
    return %arg0, %c0_i32, %c0_i32_0 : i32, i32, i32
  }
  func.func @transform_3(%arg0: i32) -> (i32, i32, i32) {
    %c0_i32 = arith.constant 0 : i32
    %c0_i32_0 = arith.constant 0 : i32
    %c0_i32_1 = arith.constant 0 : i32
    %c0_i32_2 = arith.constant 0 : i32
    return %c0_i32, %c0_i32_0, %c0_i32_1 : i32, i32, i32
  }
  func.func @transform_4(%arg0: i32) -> (i32, i32) {
    %c0_i32 = arith.constant 0 : i32
    %c0_i32_0 = arith.constant 0 : i32
    %c0_i32_1 = arith.constant 0 : i32
    return %c0_i32, %c0_i32_0 : i32, i32
  }
  func.func @transform_5(%arg0: i32) -> (i32, i32, i32) {
    %c0_i32 = arith.constant 0 : i32
    %c0_i32_0 = arith.constant 0 : i32
    %c0_i32_1 = arith.constant 0 : i32
    return %arg0, %c0_i32, %c0_i32_0 : i32, i32, i32
  }
  func.func @transform_6(%arg0: i32) -> (i32, i32, i32) {
    %c0_i32 = arith.constant 0 : i32
    %c0_i32_0 = arith.constant 0 : i32
    %c0_i32_1 = arith.constant 0 : i32
    return %arg0, %c0_i32, %c0_i32_0 : i32, i32, i32
  }
}

</mosaic_0001>

<bundles_post_ra>
// kernel: _hgnn_att_fused.1
= control target key start
LH: loop header
LB: loop body
LE: loop exit
PB: predicated region body
PF: predicated region fallthrough
CT: control target
= control target key end

     0   :  { %s4038_s0 = inlined_call_operand.vmem [shape: f32[64,128], index: 0, kind: input, shape index: {}]   ;;  %s4039_s1 = inlined_call_operand.vmem [shape: bf16[3,64,16], index: 1, kind: input, shape index: {}]   ;;  %s4040_s2 = inlined_call_operand.vmem [shape: bf16[3,16,64], index: 2, kind: input, shape index: {}]   ;;  %s4041_s3 = inlined_call_operand.hbm [shape: f32[7,128,128], index: 3, kind: input, shape index: {}]   ;;  %s4042_s4 = inlined_call_operand.vmem [shape: f32[8,128], index: 4, kind: input, shape index: {}]   ;;  %s4043_s5 = inlined_call_operand.hbm [shape: f32[3,64,128], index: 5, kind: output, shape index: {0}]   ;;  %s4044_s6 = inlined_call_operand.hbm [shape: f32[3,16,128], index: 6, kind: output, shape index: {1}]  }
   0x1   :  { %4048 = sst [smem:[#allocation12_spill]] %s4041_s3 }
   0x2   :  { %12 = vsyncpa [#allocation4], 0 }
   0x3   :  { %13 = vsyncpa [#allocation5], 0 }
   0x4   :  { %15 = vsyncpa [#allocation5 + $0x1], 0 }
   0x5   :  { %16 = vsyncpa [#allocation8], 0 }
   0x6   :  { %18 = vsyncpa [#allocation8 + $0x1], 0  ;;  %s3570_s21 = smov 0   ;;  %s3572_s22 = smov 0  }
   0x7   :  { %s3574_s23 = smov 0   ;;  %s3576_s24 = smov 0  }
   0x8 LB: > { %s3591_s25 = sadd.s32 4294967295, %s3526_s24   ;;  %s2220_s26 = sadd.s32 4294967294, %s3526_s24   ;;  %s3526_s24 = sphi %s3576_s24, %s4063_s24   ;;  %s3522_s23 = sphi %s3574_s23, %s4062_s23   ;;  %s3518_s22 = sphi %s3572_s22, %s4061_s22   ;;  %s3514_s21 = sphi %s3570_s21, %s4060_s21  }
   0x9   : > { %s3595_s27 = sadd.s32 1, %s3526_s24   ;;  %s146_s28 = sadd.s32 1, %s3522_s23 }
   0xa   : > { %s143_s29 = ssub.s32 %s3526_s24, %s3595_s27  ;;  %p156_p0 = scmp.ne.s32.totalorder %s3522_s23, %s3518_s22 }
   0xb   : > { %p144_p1 = scmp.eq.s32.totalorder %s143_s29, 0  ;;  %p157_p2 = scmp.eq.s32.totalorder %s3591_s25, 2 }
   0xc   : > { %p162_p3 = scmp.ne.s32.totalorder %s3518_s22, %s3514_s21  ;;  %p163_p4 = scmp.eq.s32.totalorder %s2220_s26, 2 }
   0xd   : > { %s3606_s30 = scalar_select %p144_p1, %s3522_s23, %s146_s28  }
   0xe   : > { %p3608_p5 = por %p157_p2, %p156_p0  ;;  %p3612_p6 = por %p163_p4, %p162_p3 }
   0xf   : > { %p2221_p7 = scmp.ge.s32.totalorder %s3526_s24, 1  ;;  %p196_p8 = scmp.lt.s32.totalorder %s3526_s24, 4 }
  0x10   : > { %s4049_s7 = scalar_select %p3608_p5, 1, 0 }
  0x11   : > { %s4050_s8 = scalar_select %p3612_p6, 1, 0 }
  0x12   : > { %p4045_p10 = scmp.eq.s32.totalorder %s3591_s25, 0  ;;  %p3620_p11 = pnand %p2221_p7, %p196_p8 }
  0x13   : > { %s3528_s10 = smov [#allocation3]   ;;  %s4053_s3 = sld [smem:[#allocation12_spill]] }
  0x14   : > { %s4051_s9 = scalar_select %p3620_p11, 1, 0 }
  0x15   : > { %s211_s11 = sshll.u32 %s3528_s10, 4  ;;  %p3213_p12 = pneg %p3620_p11  ;;  %s212_s11 = int_to_ptr.vmem [resolvable:$true] %s211_s11 }
  0x17   : > { %p3628_p13 = pnand %p4045_p10, %p3213_p12 }
  0x19   : > { %s3400_s15 = scalar_lea.hbm %s4053_s3, 14336  ;;  %p3402_p1 = pneg %p3628_p13 }
  0x1a   : > { %p3401_p0 = scmp.ne.s32.totalorder %s4053_s3, %s3400_s15  ;;  %p3407_p4 = scmp.lt.u32.totalorder %s3400_s15, %s4053_s3 }
  0x1c   : > { %p3403_p2 = pnand %p3402_p1, %p3401_p0 }
  0x1e   : > { %p3404_p3 = pneg %p3403_p2 }
  0x20   : > { %p3409_p7 = pnand %p3407_p4, %p3404_p3 }
  0x22   : > { %3412 = shalt.err (!%p3409_p7)
}
  0x23   : > { %s3413_s20 = scalar_lea.vmem %s212_s11, 14336  ;;  %p3421_p10 = scmp.lt.s32.totalorder %s212_s11, %s212_s11 }
  0x24   : > { %p3414_p8 = scmp.ne.s32.totalorder %s212_s11, %s3413_s20  ;;  %p3422_p6 = scmp.lt.s32.totalorder %s3413_s20, %s3413_s20 }
  0x26   : > { %p3416_p12 = pnand %p3414_p8, %p3402_p1  ;;  %p3423_p5 = por %p3422_p6, %p3421_p10 }
  0x28   : > { %p3417_p9 = pneg %p3416_p12 }
  0x2a   : > { %p3424_p11 = pnand %p3423_p5, %p3417_p9 }
  0x2c   : > { %3427 = shalt.err (!%p3424_p11)
}
  0x2d   : > { %s3529_s26 = smov 128   ;;  %s3530_s28 = smov 8  }
  0x2e   : > { %3216 = dma.hbm_to_vmem [thread:$0]  (!%p3628_p13), %s4053_s3, 14336, %s212_s11, [#allocation4], %s3529_s26, %s3529_s26, %s3530_s28  }
  0x2f   : > { %p4054_p0 = scmp.ne.s32.totalorder %s4051_s9, 0 }
  0x30   : > { %p4055_p2 = scmp.eq.s32.totalorder (!%p4054_p0), %s3591_s25, 0 }
  0x31   : > { %246 = sbr.rel (%p4054_p0) target bundleno = 3514 (0xdba), region = 40 }
  0x38   : > { %3501 = dma.done.wait (%p4055_p2), [#allocation4], 14336   ;;  %p4056_p1 = pmov %p4055_p2 }
  0x39   : > { %s3655_s13 = sand.u32 1, %s3518_s22   ;;  %p286_p5 = scmp.lt.s32.totalorder %s3591_s25, 2 }
  0x3a   : > { %3503 = vsyncadd (%p4056_p1), [#allocation4], 4294952960  ;;  %s2226_s12 = sshll.u32 %s3655_s13, 6  ;;  %s2227_s14 = sshll.u32 %s3655_s13, 4 }
  0x3b   : > { %s287_s11 = scalar_select %p286_p5, %s3591_s25, 2 }
  0x3c   : > { %s3671_s28 = scalar_lea.vmem [#allocation6], %s2226_s12  ;;  %s3673_s29 = scalar_lea.vmem [#allocation7], %s2227_s14 }
  0x3d   : > { %s2278_s15 = sshll.u32 %s287_s11, 5  ;;  %s2279_s9 = sshll.u32 %s287_s11, 3 }
  0x3e   : > { %s3664_s18 = scalar_lea.vmem %s4039_s1, %s2278_s15  ;;  %s3669_s26 = scalar_lea.vmem %s4040_s2, %s2279_s9 }
  0x3f   : > { %p4057_p6 = scmp.ne.s32.totalorder %s3591_s25, 0 }
  0x40   : > { %v300_v0 = vld [vmem:[%s4038_s0] sm:$0xff] (!%p4057_p6)  ;;  %v301_v1 = vld [vmem:[%s4038_s0 + $0x8] sm:$0xff] (!%p4057_p6)  ;;  %v302_v2 = vld [vmem:[%s4038_s0 + $0x10] sm:$0xff] (!%p4057_p6) }
  0x41   : > { %299 = sbr.rel (%p4057_p6) target bundleno = 72 (0x48), region = 48  ;;  %308 = vst [vmem:[#allocation2] sm:$0xff] (!%p4057_p6), %v300_v0  ;;  %309 = vst [vmem:[#allocation2 + $0x8] sm:$0xff] (!%p4057_p6), %v301_v1  ;;  %v303_v3 = vld [vmem:[%s4038_s0 + $0x18] sm:$0xff] (!%p4057_p6)  ;;  %v304_v4 = vld [vmem:[%s4038_s0 + $0x20] sm:$0xff] (!%p4057_p6) }
  0x42   : > { %310 = vst [vmem:[#allocation2 + $0x10] sm:$0xff] (!%p4057_p6), %v302_v2  ;;  %v305_v5 = vld [vmem:[%s4038_s0 + $0x28] sm:$0xff] (!%p4057_p6)  ;;  %311 = vst [vmem:[#allocation2 + $0x18] sm:$0xff] (!%p4057_p6), %v303_v3  ;;  %v306_v6 = vld [vmem:[%s4038_s0 + $0x30] sm:$0xff] (!%p4057_p6) }
  0x43   : > { %312 = vst [vmem:[#allocation2 + $0x20] sm:$0xff] (!%p4057_p6), %v304_v4  ;;  %313 = vst [vmem:[#allocation2 + $0x28] sm:$0xff] (!%p4057_p6), %v305_v5  ;;  %v307_v7 = vld [vmem:[%s4038_s0 + $0x38] sm:$0xff] (!%p4057_p6) }
  0x44   : > { %314 = vst [vmem:[#allocation2 + $0x30] sm:$0xff] (!%p4057_p6), %v306_v6  ;;  %315 = vst [vmem:[#allocation2 + $0x38] sm:$0xff] (!%p4057_p6), %v307_v7 }
  0x48 PF: > { %v344_v8 = vld [vmem:[#allocation3] sm:$0xff]  ;;  %v345_v9 = vld [vmem:[#allocation3 + $0x8] sm:$0xff]  ;;  %v346_v10 = vld [vmem:[#allocation3 + $0x10] sm:$0xff]  ;;  %vm487_vm0 = vcmask 523264   ;;  %vm644_vm1 = vcmask 130048   ;;  %s2281_s12 = sshll.u32 %s3591_s25, 8 }
  0x49   : > { %v2921_v11 = vpack.c.bf16 %v345_v9, %v344_v8  ;;  %v347_v12 = vld [vmem:[#allocation3 + $0x18] sm:$0xff]  ;;  %v348_v14 = vld [vmem:[#allocation3 + $0x20] sm:$0xff]  ;;  %v349_v15 = vld [vmem:[#allocation3 + $0x28] sm:$0xff]  ;;  %s3930_s9 = scalar_lea.hbm %s4044_s6, %s2281_s12  ;;  %s2073_s19 = scalar_lea.sflag [#allocation8], %s3655_s13 }
  0x4a   : > { %v2925_v13 = vpack.c.bf16 %v347_v12, %v346_v10  ;;  %v2929_v16 = vpack.c.bf16 %v349_v15, %v348_v14  ;;  %v316_v17 = vld [vmem:[#allocation2] sm:$0xff]  ;;  %v350_v18 = vld [vmem:[#allocation3 + $0x30] sm:$0xff]  ;;  %v351_v19 = vld [vmem:[#allocation3 + $0x38] sm:$0xff]  ;;  %p4058_p10 = scmp.ne.s32.totalorder %s4049_s7, 0  ;;  %s3531_s20 = smov [#allocation7]  }
  0x4b   : > { %2922 = vmatprep.subr.bf16.mxu1 %v2921_v11  ;;  %2555 = vmatprep.mubr.f32.mxu1 %v316_v17  ;;  %v2933_v20 = vpack.c.bf16 %v351_v19, %v350_v18  ;;  %v352_v21 = vld [vmem:[#allocation3 + $0x40] sm:$0xff]  ;;  %v353_v22 = vld [vmem:[#allocation3 + $0x48] sm:$0xff]  ;;  %v354_v24 = vld [vmem:[#allocation3 + $0x50] sm:$0xff]  ;;  %s3432_s10 = sshll.u32 %s3531_s20, 4  ;;  %s3433_s10 = int_to_ptr.vmem [resolvable:$false] %s3432_s10 }
  0x4c   : > { %2924 = vmatpush3.bf16.msra.mxu1 %v2921_v11  ;;  %v2937_v23 = vpack.c.bf16 %v353_v22, %v352_v21  ;;  %v355_v25 = vld [vmem:[#allocation3 + $0x58] sm:$0xff]  ;;  %v356_v27 = vld [vmem:[#allocation3 + $0x60] sm:$0xff]  ;;  %v357_v28 = vld [vmem:[#allocation3 + $0x68] sm:$0xff] }
  0x4d   : > { %2926 = vmatprep.subr.bf16.mxu1 %v2925_v13  ;;  %v2941_v26 = vpack.c.bf16 %v355_v25, %v354_v24  ;;  %v2945_v29 = vpack.c.bf16 %v357_v28, %v356_v27  ;;  %v358_v30 = vld [vmem:[#allocation3 + $0x70] sm:$0xff]  ;;  %v359_v31 = vld [vmem:[#allocation3 + $0x78] sm:$0xff]  ;;  %v317_v33 = vld [vmem:[#allocation2 + $0x8] sm:$0xff] }
  0x4e   : > { %v2949_v32 = vpack.c.bf16 %v359_v31, %v358_v30  ;;  %v318_v34 = vld [vmem:[#allocation2 + $0x10] sm:$0xff]  ;;  %v319_v35 = vld [vmem:[#allocation2 + $0x18] sm:$0xff]  ;;  %v320_v36 = vld [vmem:[#allocation2 + $0x20] sm:$0xff] }
  0x4f   : > { %v321_v37 = vld [vmem:[#allocation2 + $0x28] sm:$0xff]  ;;  %v322_v38 = vld [vmem:[#allocation2 + $0x30] sm:$0xff]  ;;  %v323_v39 = vld [vmem:[#allocation2 + $0x38] sm:$0xff] }
  0x50   : > { %2928 = vmatpush3.bf16.msra.mxu1 %v2925_v13  ;;  %v2299_v40 = vld [vmem:[%s3669_s26] sm:$0xff]   ;;  %v362_v62 = vld [vmem:[#allocation3 + $0x88] sm:$0xff]  ;;  %v363_v2 = vld [vmem:[#allocation3 + $0x90] sm:$0xff] }
  0x51   : > { %2930 = vmatprep.subr.bf16.mxu1 %v2929_v16  ;;  %v3702_v41 = vunpack.c.l.bf16 %v2299_v40  ;;  %v2233_v42 = vld [vmem:[%s4042_s4] ss:$0 sm:$0xff]  ;;  %v364_v3 = vld [vmem:[#allocation3 + $0x98] sm:$0xff]  ;;  %v3709_v4 = vunpack.c.h.bf16 %v2299_v40  ;;  %v366_v7 = vld [vmem:[#allocation3 + $0xa8] sm:$0xff] }
  0x52   : > { %v361_v61 = vld [vmem:[#allocation3 + $0x80] sm:$0xff]  ;;  %v2973_v5 = vpack.c.bf16 %v364_v3, %v363_v2  ;;  %v367_v9 = vld [vmem:[#allocation3 + $0xb0] sm:$0xff]  ;;  %v368_v10 = vld [vmem:[#allocation3 + $0xb8] sm:$0xff] }
  0x53   : > { %v2969_v1 = vpack.c.bf16 %v362_v62, %v361_v61  ;;  %v365_v6 = vld [vmem:[#allocation3 + $0xa0] sm:$0xff]  ;;  %v2981_v11 = vpack.c.bf16 %v368_v10, %v367_v9  ;;  %v370_v13 = vld [vmem:[#allocation3 + $0xc8] sm:$0xff]  ;;  %v371_v15 = vld [vmem:[#allocation3 + $0xd0] sm:$0xff] }
  0x54   : > { %2932 = vmatpush3.bf16.msra.mxu1 %v2929_v16  ;;  %v2977_v8 = vpack.c.bf16 %v366_v7, %v365_v6  ;;  %v369_v12 = vld [vmem:[#allocation3 + $0xc0] sm:$0xff]  ;;  %v372_v16 = vld [vmem:[#allocation3 + $0xd8] sm:$0xff]  ;;  %v374_v19 = vld [vmem:[#allocation3 + $0xe8] sm:$0xff] }
  0x55   : > { %2934 = vmatprep.subr.bf16.mxu1 %v2933_v20  ;;  %v2985_v14 = vpack.c.bf16 %v370_v13, %v369_v12  ;;  %v2989_v17 = vpack.c.bf16 %v372_v16, %v371_v15  ;;  %v373_v18 = vld [vmem:[#allocation3 + $0xe0] sm:$0xff]  ;;  %v375_v21 = vld [vmem:[#allocation3 + $0xf0] sm:$0xff]  ;;  %v376_v22 = vld [vmem:[#allocation3 + $0xf8] sm:$0xff] }
  0x56   : > { %v775_v28 = vld [vmem:[#allocation3 + $0x100] sm:$0xff]  ;;  %v788_v61 = vld [vmem:[#allocation3 + $0x168] sm:$0xff]  ;;  %v794_v13 = vld [vmem:[#allocation3 + $0x190] sm:$0xff] }
  0x57   : > { %v793_v12 = vld [vmem:[#allocation3 + $0x188] sm:$0xff]  ;;  %v795_v15 = vld [vmem:[#allocation3 + $0x198] sm:$0xff] }
  0x58   : > { %2936 = vmatpush3.bf16.msra.mxu1 %v2933_v20  ;;  %v2993_v20 = vpack.c.bf16 %v374_v19, %v373_v18  ;;  %v3057_v16 = vpack.c.bf16 %v795_v15, %v794_v13  ;;  %v797_v18 = vld [vmem:[#allocation3 + $0x1a8] sm:$0xff] }
  0x59   : > { %2938 = vmatprep.subr.bf16.mxu1 %v2937_v23 }
  0x5c   : > { %2940 = vmatpush3.bf16.msra.mxu1 %v2937_v23  ;;  %v2997_v23 = vpack.c.bf16 %v376_v22, %v375_v21  ;;  %v799_v21 = vld [vmem:[#allocation3 + $0x1b8] sm:$0xff] }
  0x5d   : > { %2942 = vmatprep.subr.bf16.mxu1 %v2941_v26 }
  0x60   : > { %2944 = vmatpush3.bf16.msra.mxu1 %v2941_v26  ;;  %v2283_v26 = vld [vmem:[%s3664_s18] sm:$0xff]  }
  0x61   : > { %2946 = vmatprep.subr.bf16.mxu1 %v2945_v29  ;;  %v3714_v27 = vunpack.c.l.bf16 %v2283_v26 }
  0x63   : > { %2625 = vmatprep.mubr.msk.f32.mxu0 %vm644_vm1, %v3714_v27 }
  0x64   : > { %2948 = vmatpush3.bf16.msra.mxu1 %v2945_v29  ;;  %v776_v29 = vld [vmem:[#allocation3 + $0x108] sm:$0xff] }
  0x65   : > { %2950 = vmatprep.subr.bf16.mxu1 %v2949_v32 }
  0x68   : > { %2952 = vmatpush3.bf16.msra.mxu1 %v2949_v32 }
  0x6b   : > { %2556 = vmatmul.mubr.f32.vlgmr.msra.gmra.mrb[0].mxu1 %v317_v33  ;;  %v2302_v33 = vld [vmem:[%s3664_s18 + $0x8] sm:$0xff]  }
  0x6c   : > { %2558 = vmatprep.mubr.f32.mxu1 %v318_v34  ;;  %v3005_v34 = vpack.c.bf16 %v776_v29, %v775_v28  ;;  %v803_v28 = vld [vmem:[#allocation3 + $0x1d8] sm:$0xff] }
  0x6f   : > { %2559 = vmatmul.mubr.f32.gmra.mrb[2].mxu1 %v319_v35  ;;  %v777_v35 = vld [vmem:[#allocation3 + $0x110] sm:$0xff] }
  0x70   : > { %2561 = vmatprep.mubr.f32.mxu1 %v320_v36  ;;  %v778_v36 = vld [vmem:[#allocation3 + $0x118] sm:$0xff] }
  0x71   : > { %v3009_v40 = vpack.c.bf16 %v778_v36, %v777_v35  ;;  %v2244_v36 = vld [vmem:[%s4042_s4 + $0x1] ss:$0 sm:$0xff] }
  0x73   : > { %2562 = vmatmul.mubr.f32.gmra.mrb[4].mxu1 %v321_v37  ;;  %v3719_v37 = vunpack.c.h.bf16 %v2283_v26  ;;  %v802_v26 = vld [vmem:[#allocation3 + $0x1d0] sm:$0xff] }
  0x74   : > { %2564 = vmatprep.mubr.f32.mxu1 %v322_v38  ;;  %v3721_v38 = vunpack.c.l.bf16 %v2302_v33  ;;  %v3073_v29 = vpack.c.bf16 %v803_v28, %v802_v26  ;;  %v1259_v26 = vld [vmem:[#allocation3 + $0x210] sm:$0xff] }
  0x77   : > { %2565 = vmatmul.mubr.f32.gmra.mrb[6].mxu1 %v323_v39  ;;  %v2303_v39 = vld [vmem:[%s3664_s18 + $0x10] sm:$0xff]  }
  0x78   : > { %2583 = vmatprep.mubr.msk.f32.mxu1 %vm487_vm0, %v3702_v41 }
 0x13e   : > { %v2557_v43 = vpop.f32.mrb[0].mxu1 }
 0x13f   : > { %v454_v44 = vadd.f32 %v2557_v43, %v2233_v42  ;;  %v448_v45 = vpop.f32.mrb[1].mxu1  ;;  %v780_v43 = vld [vmem:[#allocation3 + $0x128] sm:$0xff] }
 0x140   : > { %v449_v46 = vadd.f32 %v2233_v42, %v448_v45  ;;  %v3730_v45 = vunpack.c.l.bf16 %v2303_v39 }
 0x142   : > { %v2953_v47 = vpack.c.bf16 %v454_v44, %v449_v46  ;;  %v2560_v48 = vpop.f32.mrb[2].mxu1  ;;  %v3726_v44 = vunpack.c.h.bf16 %v2302_v33  ;;  %v2304_v46 = vld [vmem:[%s3664_s18 + $0x18] sm:$0xff]   ;;  %v806_v33 = vld [vmem:[#allocation3 + $0x1f0] sm:$0xff]  ;;  %s2102_s18 = sshll.u32 %s3673_s29, 4  ;;  %s3932_s18 = int_to_ptr.vmem [resolvable:$true] %s2102_s18 }
 0x143   : > { %v464_v49 = vadd.f32 %v2560_v48, %v2233_v42  ;;  %v458_v50 = vpop.f32.mrb[3].mxu1  ;;  %v781_v48 = vld [vmem:[#allocation3 + $0x130] sm:$0xff]  ;;  %s3428_s3 = scalar_lea.vmem %s3932_s18, 256  ;;  %p3435_p3 = scmp.lt.s32.totalorder %s3932_s18, %s3433_s10 }
 0x144   : > { %v459_v51 = vadd.f32 %v2233_v42, %v458_v50  ;;  %2954 = vmatprep.subr.bf16.mxu1 %v2953_v47  ;;  %v3735_v50 = vunpack.c.h.bf16 %v2303_v39  ;;  %p3429_p9 = scmp.ne.s32.totalorder %s3932_s18, %s3428_s3 }
 0x145   : > { %2956 = vmatpush3.bf16.msra.mxu1 %v2953_v47 }
 0x146   : > { %v2957_v52 = vpack.c.bf16 %v464_v49, %v459_v51  ;;  %v2563_v53 = vpop.f32.mrb[4].mxu1  ;;  %v782_v49 = vld [vmem:[#allocation3 + $0x138] sm:$0xff]  ;;  %v3739_v51 = vunpack.c.l.bf16 %v2304_v46  ;;  %p3430_p11 = pnand %p3429_p9, %p4058_p10 }
 0x147   : > { %v474_v54 = vadd.f32 %v2563_v53, %v2233_v42  ;;  %v468_v55 = vpop.f32.mrb[5].mxu1  ;;  %v783_v53 = vld [vmem:[#allocation3 + $0x140] sm:$0xff] }
 0x148   : > { %v469_v56 = vadd.f32 %v2233_v42, %v468_v55  ;;  %2958 = vmatprep.subr.bf16.mxu1 %v2957_v52  ;;  %v3743_v55 = vunpack.c.h.bf16 %v2304_v46  ;;  %p3431_p13 = pneg %p3430_p11 }
 0x149   : > { %2960 = vmatpush3.bf16.msra.mxu1 %v2957_v52  ;;  %v3017_v52 = vpack.c.bf16 %v782_v49, %v781_v48 }
 0x14a   : > { %v2961_v57 = vpack.c.bf16 %v474_v54, %v469_v56  ;;  %v2566_v58 = vpop.f32.mrb[6].mxu1  ;;  %v784_v54 = vld [vmem:[#allocation3 + $0x148] sm:$0xff] }
 0x14b   : > { %v484_v59 = vadd.f32 %v2566_v58, %v2233_v42  ;;  %v478_v60 = vpop.f32.mrb[7].mxu1  ;;  %v3021_v56 = vpack.c.bf16 %v784_v54, %v783_v53  ;;  %v786_v58 = vld [vmem:[#allocation3 + $0x158] sm:$0xff] }
 0x14c   : > { %v479_v63 = vadd.f32 %v2233_v42, %v478_v60  ;;  %2962 = vmatprep.subr.bf16.mxu1 %v2961_v57  ;;  %v779_v42 = vld [vmem:[#allocation3 + $0x120] sm:$0xff] }
 0x14d   : > { %2964 = vmatpush3.bf16.msra.mxu1 %v2961_v57  ;;  %v3013_v47 = vpack.c.bf16 %v780_v43, %v779_v42  ;;  %v785_v57 = vld [vmem:[#allocation3 + $0x150] sm:$0xff]  ;;  %v787_v60 = vld [vmem:[#allocation3 + $0x160] sm:$0xff] }
 0x14e   : > { %v2965_v0 = vpack.c.bf16 %v484_v59, %v479_v63  ;;  %v3025_v59 = vpack.c.bf16 %v786_v58, %v785_v57  ;;  %v3029_v62 = vpack.c.bf16 %v788_v61, %v787_v60  ;;  %v789_v63 = vld [vmem:[#allocation3 + $0x170] sm:$0xff] }
 0x150   : > { %2966 = vmatprep.subr.bf16.mxu1 %v2965_v0 }
 0x151   : > { %2968 = vmatpush3.bf16.msra.mxu1 %v2965_v0  ;;  %v790_v0 = vld [vmem:[#allocation3 + $0x178] sm:$0xff] }
 0x152   : > { %2970 = vmatprep.subr.bf16.mxu1 %v2969_v1 }
 0x154   : > { %2584 = vmatmul.mubr.msk.f32.vlgmr.msra.gmra.mrb[8].mxu1 %vm487_vm0, %v3709_v4 }
 0x155   : > { %2972 = vmatpush3.bf16.msra.mxu1 %v2969_v1  ;;  %v3033_v1 = vpack.c.bf16 %v790_v0, %v789_v63 }
 0x156   : > { %2974 = vmatprep.subr.bf16.mxu1 %v2973_v5 }
 0x159   : > { %2976 = vmatpush3.bf16.msra.mxu1 %v2973_v5 }
 0x15a   : > { %2978 = vmatprep.subr.bf16.mxu1 %v2977_v8 }
 0x15d   : > { %2980 = vmatpush3.bf16.msra.mxu1 %v2977_v8 }
 0x15e   : > { %2982 = vmatprep.subr.bf16.mxu1 %v2981_v11 }
 0x161   : > { %2984 = vmatpush3.bf16.msra.mxu1 %v2981_v11  ;;  %v792_v11 = vld [vmem:[#allocation3 + $0x180] sm:$0xff] }
 0x162   : > { %2986 = vmatprep.subr.bf16.mxu1 %v2985_v14 }
 0x165   : > { %2988 = vmatpush3.bf16.msra.mxu1 %v2985_v14  ;;  %v3053_v14 = vpack.c.bf16 %v793_v12, %v792_v11 }
 0x166   : > { %2990 = vmatprep.subr.bf16.mxu1 %v2989_v17 }
 0x169   : > { %2992 = vmatpush3.bf16.msra.mxu1 %v2989_v17  ;;  %v796_v17 = vld [vmem:[#allocation3 + $0x1a0] sm:$0xff] }
 0x16a   : > { %2994 = vmatprep.subr.bf16.mxu1 %v2993_v20  ;;  %v3061_v19 = vpack.c.bf16 %v797_v18, %v796_v17 }
 0x16d   : > { %2996 = vmatpush3.bf16.msra.mxu1 %v2993_v20  ;;  %v798_v20 = vld [vmem:[#allocation3 + $0x1b0] sm:$0xff] }
 0x16e   : > { %2998 = vmatprep.subr.bf16.mxu1 %v2997_v23  ;;  %v3065_v22 = vpack.c.bf16 %v799_v21, %v798_v20 }
 0x171   : > { %3000 = vmatpush3.bf16.msra.mxu1 %v2997_v23  ;;  %v800_v23 = vld [vmem:[#allocation3 + $0x1c0] sm:$0xff] }
 0x172   : > { %3054 = vmatprep.subr.bf16.mxu1 %v3053_v14 }
 0x227   : > { %v2585_v24 = vpop.f32.mrb[8].mxu1 }
 0x228   : > { %v560_v25 = vpop.f32.mrb[9].mxu1 }
 0x229   : > { %2618 = vmatprep.mubr.f32.mxu1 %v560_v25 }
 0x22a   : > { %2619 = vmatmul.mubr.f32.vlgmr.msra.gmra.mrb[10].mxu1 %v2585_v24  ;;  %v801_v24 = vld [vmem:[#allocation3 + $0x1c8] sm:$0xff] }
 0x22b   : > { %3056 = vmatpush3.bf16.msra.mxu1 %v3053_v14  ;;  %v3069_v25 = vpack.c.bf16 %v801_v24, %v800_v23  ;;  %v1257_v24 = vld [vmem:[#allocation3 + $0x200] sm:$0xff] }
 0x22c   : > { %3058 = vmatprep.subr.bf16.mxu1 %v3057_v16 }
 0x22f   : > { %3060 = vmatpush3.bf16.msra.mxu1 %v3057_v16 }
 0x230   : > { %3062 = vmatprep.subr.bf16.mxu1 %v3061_v19 }
 0x233   : > { %3064 = vmatpush3.bf16.msra.mxu1 %v3061_v19 }
 0x234   : > { %3066 = vmatprep.subr.bf16.mxu1 %v3065_v22 }
 0x237   : > { %3068 = vmatpush3.bf16.msra.mxu1 %v3065_v22 }
 0x238   : > { %3070 = vmatprep.subr.bf16.mxu1 %v3069_v25 }
 0x23b   : > { %3072 = vmatpush3.bf16.msra.mxu1 %v3069_v25  ;;  %v1258_v25 = vld [vmem:[#allocation3 + $0x208] sm:$0xff] }
 0x23c   : > { %3074 = vmatprep.subr.bf16.mxu1 %v3073_v29  ;;  %v3089_v28 = vpack.c.bf16 %v1258_v25, %v1257_v24 }
 0x23f   : > { %3076 = vmatpush3.bf16.msra.mxu1 %v3073_v29  ;;  %v1260_v29 = vld [vmem:[#allocation3 + $0x218] sm:$0xff] }
 0x2fd   : > { %v2620_v30 = vpop.f32.mrb[10].mxu1 }
 0x2fe   : > { %v635_v31 = vpop.f32.mrb[11].mxu1 }
 0x2ff   : > { %v3001_v32 = vpack.c.bf16 %v2620_v30, %v635_v31  ;;  %v804_v30 = vld [vmem:[#allocation3 + $0x1e0] sm:$0xff]  ;;  %v805_v31 = vld [vmem:[#allocation3 + $0x1e8] sm:$0xff] }
 0x301   : > { %3002 = vmatprep.subr.bf16.mxu0 %v3001_v32 }
 0x302   : > { %3004 = vmatpush3.bf16.msra.mxu0 %v3001_v32  ;;  %v3077_v32 = vpack.c.bf16 %v805_v31, %v804_v30  ;;  %v3093_v30 = vpack.c.bf16 %v1260_v29, %v1259_v26  ;;  %v1261_v31 = vld [vmem:[#allocation3 + $0x220] sm:$0xff] }
 0x303   : > { %3006 = vmatprep.subr.bf16.mxu0 %v3005_v34 }
 0x304   : > { %3078 = vmatprep.subr.bf16.mxu1 %v3077_v32 }
 0x305   : > { %2626 = vmatmul.mubr.msk.f32.vlgmr.msra.gmra.mrb[0].mxu0 %vm644_vm1, %v3719_v37  ;;  %3080 = vmatpush3.bf16.msra.mxu1 %v3077_v32  ;;  %v1262_v32 = vld [vmem:[#allocation3 + $0x228] sm:$0xff] }
 0x306   : > { %2628 = vmatprep.mubr.msk.f32.mxu0 %vm644_vm1, %v3721_v38  ;;  %3008 = vmatpush3.bf16.msra.mxu0 %v3005_v34  ;;  %v807_v34 = vld [vmem:[#allocation3 + $0x1f8] sm:$0xff] }
 0x307   : > { %3010 = vmatprep.subr.bf16.mxu0 %v3009_v40  ;;  %v3081_v35 = vpack.c.bf16 %v807_v34, %v806_v33  ;;  %v3097_v33 = vpack.c.bf16 %v1262_v32, %v1261_v31  ;;  %v1263_v34 = vld [vmem:[#allocation3 + $0x230] sm:$0xff] }
 0x309   : > { %2629 = vmatmul.mubr.msk.f32.gmra.mrb[2].mxu0 %vm644_vm1, %v3726_v44  ;;  %3082 = vmatprep.subr.bf16.mxu1 %v3081_v35 }
 0x30a   : > { %2631 = vmatprep.mubr.msk.f32.mxu0 %vm644_vm1, %v3730_v45  ;;  %3012 = vmatpush3.bf16.msra.mxu0 %v3009_v40 }
 0x30b   : > { %3014 = vmatprep.subr.bf16.mxu0 %v3013_v47  ;;  %3084 = vmatpush3.bf16.msra.mxu1 %v3081_v35  ;;  %v1264_v35 = vld [vmem:[#allocation3 + $0x238] sm:$0xff] }
 0x30d   : > { %2632 = vmatmul.mubr.msk.f32.gmra.mrb[4].mxu0 %vm644_vm1, %v3735_v50 }
 0x30e   : > { %2634 = vmatprep.mubr.msk.f32.mxu0 %vm644_vm1, %v3739_v51  ;;  %3016 = vmatpush3.bf16.msra.mxu0 %v3013_v47 }
 0x30f   : > { %3018 = vmatprep.subr.bf16.mxu0 %v3017_v52 }
 0x311   : > { %2635 = vmatmul.mubr.msk.f32.gmra.mrb[6].mxu0 %vm644_vm1, %v3743_v55 }
 0x312   : > { %3020 = vmatpush3.bf16.msra.mxu0 %v3017_v52 }
 0x313   : > { %3022 = vmatprep.subr.bf16.mxu0 %v3021_v56 }
 0x316   : > { %3024 = vmatpush3.bf16.msra.mxu0 %v3021_v56 }
 0x317   : > { %3026 = vmatprep.subr.bf16.mxu0 %v3025_v59 }
 0x31a   : > { %3028 = vmatpush3.bf16.msra.mxu0 %v3025_v59 }
 0x31b   : > { %3030 = vmatprep.subr.bf16.mxu0 %v3029_v62 }
 0x31e   : > { %3032 = vmatpush3.bf16.msra.mxu0 %v3029_v62 }
 0x31f   : > { %3034 = vmatprep.subr.bf16.mxu0 %v3033_v1 }
 0x322   : > { %3036 = vmatpush3.bf16.msra.mxu0 %v3033_v1 }
 0x3d8   : > { %v2627_v2 = vpop.f32.mrb[0].mxu0 }
 0x3d9   : > { %v735_v3 = vpop.f32.mrb[1].mxu0 }
 0x3da   : > { %2669 = vmatprep.mubr.f32.mxu0 %v735_v3 }
 0x3db   : > { %2670 = vmatmul.mubr.f32.vlgmr.msra.gmra.mrb[8].mxu0 %v2627_v2 }
 0x3dc   : > { %v2630_v5 = vpop.f32.mrb[2].mxu0 }
 0x3dd   : > { %v745_v6 = vpop.f32.mrb[3].mxu0 }
 0x3de   : > { %2672 = vmatprep.mubr.f32.mxu0 %v745_v6 }
 0x3df   : > { %2673 = vmatmul.mubr.f32.gmra.mrb[10].mxu0 %v2630_v5 }
 0x3e0   : > { %v2633_v7 = vpop.f32.mrb[4].mxu0 }
 0x3e1   : > { %v755_v8 = vpop.f32.mrb[5].mxu0 }
 0x3e2   : > { %2675 = vmatprep.mubr.f32.mxu0 %v755_v8 }
 0x3e3   : > { %2676 = vmatmul.mubr.f32.gmra.mrb[12].mxu0 %v2633_v7 }
 0x3e4   : > { %v2636_v9 = vpop.f32.mrb[6].mxu0 }
 0x3e5   : > { %v765_v10 = vpop.f32.mrb[7].mxu0 }
 0x3e6   : > { %2678 = vmatprep.mubr.f32.mxu0 %v765_v10 }
 0x3e7   : > { %2679 = vmatmul.mubr.f32.gmra.mrb[14].mxu0 %v2636_v9 }
 0x3e8   : > { %2697 = vmatprep.mubr.msk.f32.mxu0 %vm487_vm0, %v3702_v41 }
 0x4ae   : > { %v2671_v39 = vpop.f32.mrb[8].mxu0 }
 0x4af   : > { %v885_v40 = vadd.f32 %v2671_v39, %v2244_v36  ;;  %v879_v42 = vpop.f32.mrb[9].mxu0 }
 0x4b0   : > { %v880_v43 = vadd.f32 %v2244_v36, %v879_v42 }
 0x4b2   : > { %v3037_v46 = vpack.c.bf16 %v885_v40, %v880_v43  ;;  %v2674_v47 = vpop.f32.mrb[10].mxu0 }
 0x4b3   : > { %v895_v48 = vadd.f32 %v2674_v47, %v2244_v36  ;;  %v889_v49 = vpop.f32.mrb[11].mxu0 }
 0x4b4   : > { %v890_v52 = vadd.f32 %v2244_v36, %v889_v49  ;;  %3038 = vmatprep.subr.bf16.mxu0 %v3037_v46 }
 0x4b5   : > { %3040 = vmatpush3.bf16.msra.mxu0 %v3037_v46 }
 0x4b6   : > { %v3041_v53 = vpack.c.bf16 %v895_v48, %v890_v52  ;;  %v2677_v54 = vpop.f32.mrb[12].mxu0 }
 0x4b7   : > { %v905_v56 = vadd.f32 %v2677_v54, %v2244_v36  ;;  %v899_v57 = vpop.f32.mrb[13].mxu0 }
 0x4b8   : > { %v900_v58 = vadd.f32 %v2244_v36, %v899_v57  ;;  %3042 = vmatprep.subr.bf16.mxu0 %v3041_v53 }
 0x4b9   : > { %3044 = vmatpush3.bf16.msra.mxu0 %v3041_v53 }
 0x4ba   : > { %v3045_v59 = vpack.c.bf16 %v905_v56, %v900_v58  ;;  %v2680_v60 = vpop.f32.mrb[14].mxu0 }
 0x4bb   : > { %v915_v61 = vadd.f32 %v2680_v60, %v2244_v36  ;;  %v909_v62 = vpop.f32.mrb[15].mxu0 }
 0x4bc   : > { %v910_v63 = vadd.f32 %v2244_v36, %v909_v62  ;;  %3046 = vmatprep.subr.bf16.mxu0 %v3045_v59  ;;  %v3101_v36 = vpack.c.bf16 %v1264_v35, %v1263_v34 }
 0x4bd   : > { %3048 = vmatpush3.bf16.msra.mxu0 %v3045_v59 }
 0x4be   : > { %v3049_v0 = vpack.c.bf16 %v915_v61, %v910_v63 }
 0x4c0   : > { %3050 = vmatprep.subr.bf16.mxu0 %v3049_v0 }
 0x4c1   : > { %3052 = vmatpush3.bf16.msra.mxu0 %v3049_v0 }
 0x4c4   : > { %2698 = vmatmul.mubr.msk.f32.vlgmr.msra.gmra.mrb[16].mxu0 %vm487_vm0, %v3709_v4 }
 0x4c5   : > { %2739 = vmatprep.mubr.msk.f32.mxu0 %vm644_vm1, %v3714_v27 }
 0x597   : > { %v2699_v1 = vpop.f32.mrb[16].mxu0 }
 0x598   : > { %v984_v2 = vpop.f32.mrb[17].mxu0 }
 0x599   : > { %2732 = vmatprep.mubr.f32.mxu1 %v984_v2 }
 0x59a   : > { %2733 = vmatmul.mubr.f32.vlgmr.msra.gmra.mrb[12].mxu1 %v2699_v1 }
 0x59b   : > { %2811 = vmatprep.mubr.msk.f32.mxu1 %vm487_vm0, %v3702_v41  ;;  %v1173_v41 = vlaneseq }
 0x59d   : > { %v1174_v7 = vand.u32 127, %v1173_v41 }
 0x59f   : > { %vm1175_vm2 = vcmp.lt.s32.totalorder %v1174_v7, 32 }
 0x66d   : > { %v2734_v3 = vpop.f32.mrb[12].mxu1 }
 0x66e   : > { %v1059_v5 = vpop.f32.mrb[13].mxu1 }
 0x66f   : > { %v3085_v6 = vpack.c.bf16 %v2734_v3, %v1059_v5 }
 0x671   : > { %3086 = vmatprep.subr.bf16.mxu0 %v3085_v6 }
 0x672   : > { %3088 = vmatpush3.bf16.msra.mxu0 %v3085_v6 }
 0x673   : > { %3090 = vmatprep.subr.bf16.mxu0 %v3089_v28 }
 0x675   : > { %2740 = vmatmul.mubr.msk.f32.vlgmr.msra.gmra.mrb[18].mxu0 %vm644_vm1, %v3719_v37 }
 0x676   : > { %2742 = vmatprep.mubr.msk.f32.mxu0 %vm644_vm1, %v3721_v38  ;;  %3092 = vmatpush3.bf16.msra.mxu0 %v3089_v28 }
 0x677   : > { %3094 = vmatprep.subr.bf16.mxu0 %v3093_v30 }
 0x679   : > { %2743 = vmatmul.mubr.msk.f32.gmra.mrb[20].mxu0 %vm644_vm1, %v3726_v44 }
 0x67a   : > { %2745 = vmatprep.mubr.msk.f32.mxu0 %vm644_vm1, %v3730_v45  ;;  %3096 = vmatpush3.bf16.msra.mxu0 %v3093_v30 }
 0x67b   : > { %3098 = vmatprep.subr.bf16.mxu0 %v3097_v33 }
 0x67d   : > { %2746 = vmatmul.mubr.msk.f32.gmra.mrb[22].mxu0 %vm644_vm1, %v3735_v50 }
 0x67e   : > { %2748 = vmatprep.mubr.msk.f32.mxu0 %vm644_vm1, %v3739_v51  ;;  %3100 = vmatpush3.bf16.msra.mxu0 %v3097_v33 }
 0x67f   : > { %3102 = vmatprep.subr.bf16.mxu0 %v3101_v36 }
 0x681   : > { %2749 = vmatmul.mubr.msk.f32.gmra.mrb[24].mxu0 %vm644_vm1, %v3743_v55 }
 0x682   : > { %3104 = vmatpush3.bf16.msra.mxu0 %v3101_v36 }
 0x748   : > { %v2741_v8 = vpop.f32.mrb[18].mxu0 }
 0x749   : > { %v1134_v9 = vpop.f32.mrb[19].mxu0  ;;  %v1177_v13 = vsel %vm1175_vm2, %v2741_v8, -1e+30 }
 0x74a   : > { %v1176_v10 = vsel %vm1175_vm2, %v1134_v9, -1e+30 }
 0x74b   : > { %1184 = vmax.xlane.f32.xlu0 %v1176_v10 }
 0x74c   : > { %v2744_v11 = vpop.f32.mrb[20].mxu0 }
 0x74d   : > { %v1144_v12 = vpop.f32.mrb[21].mxu0  ;;  %v1179_v17 = vsel %vm1175_vm2, %v2744_v11, -1e+30 }
 0x74e   : > { %v1178_v14 = vsel %vm1175_vm2, %v1144_v12, -1e+30  ;;  %v1265_v12 = vld [vmem:[#allocation3 + $0x240] sm:$0xff] }
 0x74f   : > { %1186 = vmax.xlane.f32.xlu0 %v1177_v13  ;;  %1188 = vmax.xlane.f32.xlu1 %v1178_v14 }
 0x750   : > { %v2747_v15 = vpop.f32.mrb[22].mxu0 }
 0x751   : > { %v1154_v16 = vpop.f32.mrb[23].mxu0  ;;  %v1181_v21 = vsel %vm1175_vm2, %v2747_v15, -1e+30 }
 0x752   : > { %v1180_v18 = vsel %vm1175_vm2, %v1154_v16, -1e+30  ;;  %v1267_v16 = vld [vmem:[#allocation3 + $0x250] sm:$0xff] }
 0x753   : > { %1190 = vmax.xlane.f32.xlu1 %v1179_v17  ;;  %1192 = vmax.xlane.f32.xlu0 %v1180_v18 }
 0x754   : > { %v2750_v19 = vpop.f32.mrb[24].mxu0 }
 0x755   : > { %v1164_v20 = vpop.f32.mrb[25].mxu0  ;;  %v1183_v23 = vsel %vm1175_vm2, %v2750_v19, -1e+30  ;;  %v1269_v19 = vld [vmem:[#allocation3 + $0x260] sm:$0xff] }
 0x756   : > { %v1182_v22 = vsel %vm1175_vm2, %v1164_v20, -1e+30  ;;  %v1270_v20 = vld [vmem:[#allocation3 + $0x268] sm:$0xff] }
 0x757   : > { %1194 = vmax.xlane.f32.xlu1 %v1181_v21  ;;  %1196 = vmax.xlane.f32.xlu0 %v1182_v22 }
 0x75b   : > { %1198 = vmax.xlane.f32.xlu1 %v1183_v23 }
 0x7d8   : > { %v1185_v39 = vpop.xlane.xlu0 %1184 }
 0x7d9   : > { %v1200_v40 = vsub.f32 %v1176_v10, %v1185_v39 }
 0x7db   : > { %v1208_v42 = vmul.f32 1.442695, %v1200_v40 }
 0x7dc   : > { %v1187_v43 = vpop.xlane.xlu0 %1186  ;;  %v1189_v46 = vpop.xlane.xlu1 %1188 }
 0x7dd   : > { %3264 = vpow2.f32 %v1208_v42  ;;  %v1201_v47 = vsub.f32 %v1177_v13, %v1187_v43  ;;  %v1202_v48 = vsub.f32 %v1178_v14, %v1189_v46  ;;  %v1266_v13 = vld [vmem:[#allocation3 + $0x248] sm:$0xff] }
 0x7de   : > { %v3105_v14 = vpack.c.bf16 %v1266_v13, %v1265_v12  ;;  %v1274_v12 = vld [vmem:[#allocation3 + $0x280] sm:$0xff]  ;;  %v1275_v13 = vld [vmem:[#allocation3 + $0x288] sm:$0xff] }
 0x7df   : > { %v1210_v49 = vmul.f32 1.442695, %v1201_v47  ;;  %v1212_v52 = vmul.f32 1.442695, %v1202_v48 }
 0x7e0   : > { %v1191_v53 = vpop.xlane.xlu1 %1190  ;;  %v1193_v54 = vpop.xlane.xlu0 %1192  ;;  %3106 = vmatprep.subr.bf16.mxu0 %v3105_v14 }
 0x7e1   : > { %3266 = vpow2.f32 %v1210_v49  ;;  %v1203_v56 = vsub.f32 %v1179_v17, %v1191_v53  ;;  %v1204_v57 = vsub.f32 %v1180_v18, %v1193_v54  ;;  %3108 = vmatpush3.bf16.msra.mxu0 %v3105_v14  ;;  %v1268_v17 = vld [vmem:[#allocation3 + $0x258] sm:$0xff] }
 0x7e2   : > { %3268 = vpow2.f32 %v1212_v52  ;;  %v3109_v18 = vpack.c.bf16 %v1268_v17, %v1267_v16  ;;  %v3137_v16 = vpack.c.bf16 %v1275_v13, %v1274_v12  ;;  %v1276_v17 = vld [vmem:[#allocation3 + $0x290] sm:$0xff]  ;;  %v3828_v12 = vld [vmem:[#allocation2 + $0x18] sm:$0xff]  ;;  %v3831_v13 = vld [vmem:[#allocation2 + $0x20] sm:$0xff] }
 0x7e3   : > { %v1214_v58 = vmul.f32 1.442695, %v1203_v56  ;;  %v1216_v59 = vmul.f32 1.442695, %v1204_v57 }
 0x7e4   : > { %v1195_v60 = vpop.xlane.xlu1 %1194  ;;  %v1197_v61 = vpop.xlane.xlu0 %1196  ;;  %3110 = vmatprep.subr.bf16.mxu0 %v3109_v18 }
 0x7e5   : > { %3270 = vpow2.f32 %v1214_v58  ;;  %v1205_v62 = vsub.f32 %v1181_v21, %v1195_v60  ;;  %v1206_v63 = vsub.f32 %v1182_v22, %v1197_v61  ;;  %3112 = vmatpush3.bf16.msra.mxu0 %v3109_v18  ;;  %v3113_v21 = vpack.c.bf16 %v1270_v20, %v1269_v19  ;;  %v1271_v22 = vld [vmem:[#allocation3 + $0x270] sm:$0xff]  ;;  %v2255_v58 = vld [vmem:[%s4042_s4 + $0x2] ss:$0 sm:$0xff]  ;;  %v1277_v18 = vld [vmem:[#allocation3 + $0x298] sm:$0xff] }
 0x7e6   : > { %3272 = vpow2.f32 %v1216_v59  ;;  %v3141_v19 = vpack.c.bf16 %v1277_v18, %v1276_v17  ;;  %v1278_v20 = vld [vmem:[#allocation3 + $0x2a0] sm:$0xff] }
 0x7e7   : > { %v3265_v0 = vpop.eup %3264  ;;  %v1218_v1 = vmul.f32 1.442695, %v1205_v62  ;;  %v1220_v2 = vmul.f32 1.442695, %v1206_v63  ;;  %3114 = vmatprep.subr.bf16.mxu0 %v3113_v21 }
 0x7e8   : > { %v1199_v3 = vpop.xlane.xlu1 %1198  ;;  %1224 = vadd.xlane.f32.xlu0 %v3265_v0 }
 0x7e9   : > { %3274 = vpow2.f32 %v1218_v1  ;;  %v1207_v5 = vsub.f32 %v1183_v23, %v1199_v3  ;;  %3116 = vmatpush3.bf16.msra.mxu0 %v3113_v21  ;;  %v1272_v23 = vld [vmem:[#allocation3 + $0x278] sm:$0xff]  ;;  %v1279_v21 = vld [vmem:[#allocation3 + $0x2a8] sm:$0xff] }
 0x7ea   : > { %3276 = vpow2.f32 %v1220_v2  ;;  %v3117_v24 = vpack.c.bf16 %v1272_v23, %v1271_v22  ;;  %v3145_v22 = vpack.c.bf16 %v1279_v21, %v1278_v20  ;;  %v1280_v23 = vld [vmem:[#allocation3 + $0x2b0] sm:$0xff] }
 0x7eb   : > { %v3267_v6 = vpop.eup %3266  ;;  %v1222_v41 = vmul.f32 1.442695, %v1207_v5 }
 0x7ec   : > { %v3269_v7 = vpop.eup %3268  ;;  %1226 = vadd.xlane.f32.xlu1 %v3267_v6  ;;  %3118 = vmatprep.subr.bf16.mxu0 %v3117_v24 }
 0x7ed   : > { %3278 = vpow2.f32 %v1222_v41  ;;  %1228 = vadd.xlane.f32.xlu0 %v3269_v7  ;;  %3120 = vmatpush3.bf16.msra.mxu0 %v3117_v24  ;;  %v1281_v24 = vld [vmem:[#allocation3 + $0x2b8] sm:$0xff] }
 0x7ef   : > { %v3271_v8 = vpop.eup %3270 }
 0x7f0   : > { %v3273_v9 = vpop.eup %3272  ;;  %1230 = vadd.xlane.f32.xlu1 %v3271_v8 }
 0x7f1   : > { %1232 = vadd.xlane.f32.xlu0 %v3273_v9 }
 0x7f3   : > { %v3275_v10 = vpop.eup %3274 }
 0x7f4   : > { %v3277_v11 = vpop.eup %3276  ;;  %1234 = vadd.xlane.f32.xlu1 %v3275_v10 }
 0x7f5   : > { %1236 = vadd.xlane.f32.xlu0 %v3277_v11 }
 0x7f7   : > { %v3279_v15 = vpop.eup %3278 }
 0x7f8   : > { %1238 = vadd.xlane.f32.xlu1 %v3279_v15 }
 0x875   : > { %v1225_v25 = vpop.xlane.xlu0 %1224 }
 0x876   : > { %3280 = vrcp.f32 %v1225_v25  ;;  %v3149_v25 = vpack.c.bf16 %v1281_v24, %v1280_v23 }
 0x879   : > { %v1227_v26 = vpop.xlane.xlu1 %1226 }
 0x87a   : > { %3282 = vrcp.f32 %v1227_v26  ;;  %v1229_v28 = vpop.xlane.xlu0 %1228  ;;  %v1282_v26 = vld [vmem:[#allocation3 + $0x2c0] sm:$0xff] }
 0x87b   : > { %3284 = vrcp.f32 %v1229_v28  ;;  %v1283_v28 = vld [vmem:[#allocation3 + $0x2c8] sm:$0xff] }
 0x87d   : > { %v1231_v29 = vpop.xlane.xlu1 %1230 }
 0x87e   : > { %3286 = vrcp.f32 %v1231_v29  ;;  %v1233_v30 = vpop.xlane.xlu0 %1232  ;;  %v3153_v29 = vpack.c.bf16 %v1283_v28, %v1282_v26 }
 0x87f   : > { %3288 = vrcp.f32 %v1233_v30  ;;  %v1284_v30 = vld [vmem:[#allocation3 + $0x2d0] sm:$0xff] }
 0x880   : > { %v3281_v31 = vpop.eup %3280 }
 0x881   : > { %v1235_v32 = vpop.xlane.xlu1 %1234  ;;  %v1241_v33 = vmul.f32 %v3281_v31, %v3265_v0  ;;  %v1285_v31 = vld [vmem:[#allocation3 + $0x2d8] sm:$0xff] }
 0x882   : > { %3290 = vrcp.f32 %v1235_v32  ;;  %v1237_v34 = vpop.xlane.xlu0 %1236  ;;  %v3157_v32 = vpack.c.bf16 %v1285_v31, %v1284_v30 }
 0x883   : > { %3292 = vrcp.f32 %v1237_v34  ;;  %2783 = vmatprep.mubr.f32.mxu0 %v1241_v33  ;;  %v1286_v33 = vld [vmem:[#allocation3 + $0x2e0] sm:$0xff] }
 0x884   : > { %v3283_v35 = vpop.eup %3282 }
 0x885   : > { %v3285_v36 = vpop.eup %3284  ;;  %v1243_v39 = vmul.f32 %v3283_v35, %v3267_v6  ;;  %v1239_v40 = vpop.xlane.xlu1 %1238  ;;  %v1288_v35 = vld [vmem:[#allocation3 + $0x2f0] sm:$0xff] }
 0x886   : > { %3294 = vrcp.f32 %v1239_v40  ;;  %v1245_v42 = vmul.f32 %v3285_v36, %v3269_v7  ;;  %v1289_v36 = vld [vmem:[#allocation3 + $0x2f8] sm:$0xff] }
 0x887   : > { %2784 = vmatmul.mubr.f32.vlgmr.msra.gmra.mrb[26].mxu0 %v1243_v39  ;;  %v3165_v39 = vpack.c.bf16 %v1289_v36, %v1288_v35 }
 0x888   : > { %v3287_v43 = vpop.eup %3286  ;;  %2786 = vmatprep.mubr.f32.mxu0 %v1245_v42 }
 0x889   : > { %v3289_v46 = vpop.eup %3288  ;;  %v1247_v47 = vmul.f32 %v3287_v43, %v3271_v8  ;;  %v3792_v43 = vld [vmem:[%s4042_s4 + $0x3] ss:$0 sm:$0xff] }
 0x88a   : > { %v1249_v48 = vmul.f32 %v3289_v46, %v3273_v9  ;;  %v1694_v46 = vld [vmem:[#allocation3 + $0x300] sm:$0xff] }
 0x88b   : > { %2787 = vmatmul.mubr.f32.gmra.mrb[28].mxu0 %v1247_v47  ;;  %v1695_v47 = vld [vmem:[#allocation3 + $0x308] sm:$0xff] }
 0x88c   : > { %v3291_v49 = vpop.eup %3290  ;;  %2789 = vmatprep.mubr.f32.mxu0 %v1249_v48 }
 0x88d   : > { %v3293_v52 = vpop.eup %3292  ;;  %v1251_v53 = vmul.f32 %v3291_v49, %v3275_v10  ;;  %v3797_v49 = vld [vmem:[%s4042_s4 + $0x4] ss:$0 sm:$0xff] }
 0x88e   : > { %v1253_v54 = vmul.f32 %v3293_v52, %v3277_v11 }
 0x88f   : > { %2790 = vmatmul.mubr.f32.gmra.mrb[30].mxu0 %v1251_v53 }
 0x890   : > { %v3295_v56 = vpop.eup %3294  ;;  %2792 = vmatprep.mubr.f32.mxu0 %v1253_v54 }
 0x891   : > { %v1255_v57 = vmul.f32 %v3295_v56, %v3279_v15 }
 0x893   : > { %2793 = vmatmul.mubr.f32.gmra.mrb[32].mxu0 %v1255_v57  ;;  %v3173_v57 = vpack.c.bf16 %v1695_v47, %v1694_v46 }
 0x894   : > { %2853 = vmatprep.mubr.msk.f32.mxu0 %vm644_vm1, %v3714_v27 }
 0x95a   : > { %v2785_v59 = vpop.f32.mrb[26].mxu0 }
 0x95b   : > { %v1367_v60 = vadd.f32 %v2785_v59, %v2255_v58  ;;  %v1361_v61 = vpop.f32.mrb[27].mxu0  ;;  %v1696_v59 = vld [vmem:[#allocation3 + $0x310] sm:$0xff] }
 0x95c   : > { %v1362_v62 = vadd.f32 %v2255_v58, %v1361_v61 }
 0x95e   : > { %v3121_v63 = vpack.c.bf16 %v1367_v60, %v1362_v62  ;;  %v2788_v0 = vpop.f32.mrb[28].mxu0  ;;  %v1697_v60 = vld [vmem:[#allocation3 + $0x318] sm:$0xff] }
 0x95f   : > { %v1377_v1 = vadd.f32 %v2788_v0, %v2255_v58  ;;  %v1371_v2 = vpop.f32.mrb[29].mxu0  ;;  %v3177_v62 = vpack.c.bf16 %v1697_v60, %v1696_v59  ;;  %v1699_v0 = vld [vmem:[#allocation3 + $0x328] sm:$0xff]  ;;  %v3886_v59 = vld [vmem:[%s4042_s4 + $0x5] ss:$0 sm:$0xff] }
 0x960   : > { %v1372_v3 = vadd.f32 %v2255_v58, %v1371_v2  ;;  %3122 = vmatprep.subr.bf16.mxu1 %v3121_v63  ;;  %v1700_v2 = vld [vmem:[#allocation3 + $0x330] sm:$0xff] }
 0x961   : > { %3124 = vmatpush3.bf16.msra.mxu1 %v3121_v63  ;;  %v1698_v63 = vld [vmem:[#allocation3 + $0x320] sm:$0xff] }
 0x962   : > { %v3125_v5 = vpack.c.bf16 %v1377_v1, %v1372_v3  ;;  %v2791_v6 = vpop.f32.mrb[30].mxu0  ;;  %v3181_v1 = vpack.c.bf16 %v1699_v0, %v1698_v63  ;;  %v1701_v3 = vld [vmem:[#allocation3 + $0x338] sm:$0xff] }
 0x963   : > { %v1387_v41 = vadd.f32 %v2791_v6, %v2255_v58  ;;  %v1381_v7 = vpop.f32.mrb[31].mxu0  ;;  %v1702_v6 = vld [vmem:[#allocation3 + $0x340] sm:$0xff] }
 0x964   : > { %v1382_v27 = vadd.f32 %v2255_v58, %v1381_v7  ;;  %3126 = vmatprep.subr.bf16.mxu1 %v3125_v5  ;;  %v1705_v7 = vld [vmem:[#allocation3 + $0x358] sm:$0xff] }
 0x965   : > { %3128 = vmatpush3.bf16.msra.mxu1 %v3125_v5  ;;  %v3185_v5 = vpack.c.bf16 %v1701_v3, %v1700_v2 }
 0x966   : > { %v3129_v8 = vpack.c.bf16 %v1387_v41, %v1382_v27  ;;  %v2794_v9 = vpop.f32.mrb[32].mxu0  ;;  %v1703_v41 = vld [vmem:[#allocation3 + $0x348] sm:$0xff]  ;;  %v1706_v27 = vld [vmem:[#allocation3 + $0x360] sm:$0xff] }
 0x967   : > { %v1397_v10 = vadd.f32 %v2794_v9, %v2255_v58  ;;  %v1391_v11 = vpop.f32.mrb[33].mxu0  ;;  %v1709_v9 = vld [vmem:[#allocation3 + $0x378] sm:$0xff] }
 0x968   : > { %v1392_v14 = vadd.f32 %v2255_v58, %v1391_v11  ;;  %3130 = vmatprep.subr.bf16.mxu1 %v3129_v8  ;;  %v3825_v11 = vld [vmem:[#allocation2 + $0x10] sm:$0xff] }
 0x969   : > { %3132 = vmatpush3.bf16.msra.mxu1 %v3129_v8  ;;  %v1708_v8 = vld [vmem:[#allocation3 + $0x370] sm:$0xff] }
 0x96a   : > { %v3133_v15 = vpack.c.bf16 %v1397_v10, %v1392_v14  ;;  %v3201_v10 = vpack.c.bf16 %v1709_v9, %v1708_v8  ;;  %v3834_v14 = vld [vmem:[#allocation2 + $0x28] sm:$0xff] }
 0x96c   : > { %3134 = vmatprep.subr.bf16.mxu1 %v3133_v15 }
 0x96d   : > { %3136 = vmatpush3.bf16.msra.mxu1 %v3133_v15  ;;  %v3837_v15 = vld [vmem:[#allocation2 + $0x30] sm:$0xff] }
 0x96e   : > { %3138 = vmatprep.subr.bf16.mxu1 %v3137_v16 }
 0x970   : > { %2812 = vmatmul.mubr.msk.f32.vlgmr.msra.gmra.mrb[14].mxu1 %vm487_vm0, %v3709_v4  ;;  %v1287_v4 = vld [vmem:[#allocation3 + $0x2e8] sm:$0xff] }
 0x971   : > { %3140 = vmatpush3.bf16.msra.mxu1 %v3137_v16  ;;  %v3161_v34 = vpack.c.bf16 %v1287_v4, %v1286_v33  ;;  %v3840_v16 = vld [vmem:[#allocation2 + $0x38] sm:$0xff] }
 0x972   : > { %3142 = vmatprep.subr.bf16.mxu1 %v3141_v19 }
 0x975   : > { %3144 = vmatpush3.bf16.msra.mxu1 %v3141_v19 }
 0x976   : > { %3146 = vmatprep.subr.bf16.mxu1 %v3145_v22 }
 0x979   : > { %3148 = vmatpush3.bf16.msra.mxu1 %v3145_v22 }
 0x97a   : > { %3150 = vmatprep.subr.bf16.mxu1 %v3149_v25 }
 0x97d   : > { %3152 = vmatpush3.bf16.msra.mxu1 %v3149_v25 }
 0x97e   : > { %3154 = vmatprep.subr.bf16.mxu1 %v3153_v29 }
 0x981   : > { %3156 = vmatpush3.bf16.msra.mxu1 %v3153_v29 }
 0x982   : > { %3158 = vmatprep.subr.bf16.mxu1 %v3157_v32 }
 0x985   : > { %3160 = vmatpush3.bf16.msra.mxu1 %v3157_v32 }
 0x986   : > { %3162 = vmatprep.subr.bf16.mxu1 %v3161_v34 }
 0x989   : > { %3164 = vmatpush3.bf16.msra.mxu1 %v3161_v34 }
 0x98a   : > { %3166 = vmatprep.subr.bf16.mxu1 %v3165_v39 }
 0x98d   : > { %3168 = vmatpush3.bf16.msra.mxu1 %v3165_v39 }
 0xa43   : > { %v2813_v40 = vpop.f32.mrb[14].mxu1 }
 0xa44   : > { %v1466_v42 = vpop.f32.mrb[15].mxu1 }
 0xa45   : > { %2846 = vmatprep.mubr.f32.mxu1 %v1466_v42 }
 0xa46   : > { %2847 = vmatmul.mubr.f32.vlgmr.msra.gmra.mrb[16].mxu1 %v2813_v40 }
 0xb19   : > { %v2848_v48 = vpop.f32.mrb[16].mxu1 }
 0xb1a   : > { %v1690_v52 = vmul.f32 %v2848_v48, %v3792_v43  ;;  %v1541_v53 = vpop.f32.mrb[17].mxu1 }
 0xb1b   : > { %v3169_v54 = vpack.c.bf16 %v2848_v48, %v1541_v53  ;;  %v1689_v56 = vmul.f32 %v3792_v43, %v1541_v53 }
 0xb1c   : > { %v1692_v58 = vadd.f32 %v3797_v49, %v1690_v52 }
 0xb1d   : > { %v1691_v61 = vadd.f32 %v3797_v49, %v1689_v56  ;;  %3170 = vmatprep.subr.bf16.mxu0 %v3169_v54 }
 0xb1e   : > { %2058 = vst [vmem:[%s3673_s29 + $0x8] sm:$0xff] %v1692_v58  ;;  %3172 = vmatpush3.bf16.msra.mxu0 %v3169_v54 }
 0xb1f   : > { %2057 = vst [vmem:[%s3673_s29] sm:$0xff] %v1691_v61  ;;  %3174 = vmatprep.subr.bf16.mxu0 %v3173_v57  ;;  %s3434_s29 = scalar_lea.vmem %s3433_s10, 512 }
 0xb20   : > { %p3436_p4 = scmp.lt.s32.totalorder %s3434_s29, %s3428_s3 }
 0xb21   : > { %2854 = vmatmul.mubr.msk.f32.vlgmr.msra.gmra.mrb[34].mxu0 %vm644_vm1, %v3719_v37  ;;  %v3189_v37 = vpack.c.bf16 %v1703_v41, %v1702_v6 }
 0xb22   : > { %2856 = vmatprep.mubr.msk.f32.mxu0 %vm644_vm1, %v3721_v38  ;;  %3176 = vmatpush3.bf16.msra.mxu0 %v3173_v57  ;;  %v1704_v38 = vld [vmem:[#allocation3 + $0x350] sm:$0xff]  ;;  %p3437_p7 = por %p3436_p4, %p3435_p3 }
 0xb23   : > { %3178 = vmatprep.subr.bf16.mxu0 %v3177_v62 }
 0xb24   : > { %p3438_p8 = pnand %p3437_p7, %p3431_p13 }
 0xb25   : > { %2857 = vmatmul.mubr.msk.f32.gmra.mrb[36].mxu0 %vm644_vm1, %v3726_v44  ;;  %v3819_v44 = vld [vmem:[#allocation2] sm:$0xff] }
 0xb26   : > { %2859 = vmatprep.mubr.msk.f32.mxu0 %vm644_vm1, %v3730_v45  ;;  %3180 = vmatpush3.bf16.msra.mxu0 %v3177_v62  ;;  %v3193_v45 = vpack.c.bf16 %v1705_v7, %v1704_v38 }
 0xb27   : > { %3182 = vmatprep.subr.bf16.mxu0 %v3181_v1 }
 0xb29   : > { %2860 = vmatmul.mubr.msk.f32.gmra.mrb[38].mxu0 %vm644_vm1, %v3735_v50  ;;  %v1707_v50 = vld [vmem:[#allocation3 + $0x368] sm:$0xff] }
 0xb2a   : > { %2862 = vmatprep.mubr.msk.f32.mxu0 %vm644_vm1, %v3739_v51  ;;  %3184 = vmatpush3.bf16.msra.mxu0 %v3181_v1  ;;  %v3197_v51 = vpack.c.bf16 %v1707_v50, %v1706_v27 }
 0xb2b   : > { %3186 = vmatprep.subr.bf16.mxu0 %v3185_v5 }
 0xb2d   : > { %2863 = vmatmul.mubr.msk.f32.gmra.mrb[40].mxu0 %vm644_vm1, %v3743_v55  ;;  %v3822_v55 = vld [vmem:[#allocation2 + $0x8] sm:$0xff] }
 0xb2e   : > { %3188 = vmatpush3.bf16.msra.mxu0 %v3185_v5  ;;  %2897 = vmatprep.mubr.f32.mxu0 %v3819_v44 }
 0xb2f   : > { %3190 = vmatprep.subr.bf16.mxu0 %v3189_v37 }
 0xb32   : > { %3192 = vmatpush3.bf16.msra.mxu0 %v3189_v37 }
 0xb33   : > { %3194 = vmatprep.subr.bf16.mxu0 %v3193_v45 }
 0xb36   : > { %3196 = vmatpush3.bf16.msra.mxu0 %v3193_v45 }
 0xb37   : > { %3198 = vmatprep.subr.bf16.mxu0 %v3197_v51 }
 0xb3a   : > { %3200 = vmatpush3.bf16.msra.mxu0 %v3197_v51 }
 0xb3b   : > { %3202 = vmatprep.subr.bf16.mxu0 %v3201_v10 }
 0xb3e   : > { %3204 = vmatpush3.bf16.msra.mxu0 %v3201_v10 }
 0xb41   : > { %2898 = vmatmul.mubr.f32.vlgmr.msra.gmra.mrb[42].mxu0 %v3822_v55 }
 0xb42   : > { %2900 = vmatprep.mubr.f32.mxu0 %v3825_v11 }
 0xb45   : > { %2901 = vmatmul.mubr.f32.gmra.mrb[44].mxu0 %v3828_v12 }
 0xb46   : > { %2903 = vmatprep.mubr.f32.mxu0 %v3831_v13 }
 0xb49   : > { %2904 = vmatmul.mubr.f32.gmra.mrb[46].mxu0 %v3834_v14 }
 0xb4a   : > { %2906 = vmatprep.mubr.f32.mxu0 %v3837_v15 }
 0xb4d   : > { %2907 = vmatmul.mubr.f32.gmra.mrb[48].mxu0 %v3840_v16 }
 0xbf4   : > { %v2855_v17 = vpop.f32.mrb[34].mxu0 }
 0xbf5   : > { %3296 = vtanh.f32 %v2855_v17  ;;  %v1616_v18 = vpop.f32.mrb[35].mxu0 }
 0xbf6   : > { %3298 = vtanh.f32 %v1616_v18 }
 0xbf8   : > { %v2858_v19 = vpop.f32.mrb[36].mxu0 }
 0xbf9   : > { %3300 = vtanh.f32 %v2858_v19  ;;  %v1626_v20 = vpop.f32.mrb[37].mxu0 }
 0xbfa   : > { %3302 = vtanh.f32 %v1626_v20 }
 0xbfc   : > { %v2861_v21 = vpop.f32.mrb[38].mxu0 }
 0xbfd   : > { %3304 = vtanh.f32 %v2861_v21  ;;  %v1636_v22 = vpop.f32.mrb[39].mxu0 }
 0xbfe   : > { %3306 = vtanh.f32 %v1636_v22 }
 0xbff   : > { %v3297_v23 = vpop.eup %3296 }
 0xc00   : > { %v3299_v24 = vpop.eup %3298  ;;  %v2864_v25 = vpop.f32.mrb[40].mxu0  ;;  %v1670_v26 = vmul.f32 %v3297_v23, %v3792_v43 }
 0xc01   : > { %3308 = vtanh.f32 %v2864_v25  ;;  %v1646_v28 = vpop.f32.mrb[41].mxu0  ;;  %v1669_v29 = vmul.f32 %v3299_v24, %v3792_v43 }
 0xc02   : > { %3310 = vtanh.f32 %v1646_v28  ;;  %v3849_v33 = vadd.f32 %v3797_v49, %v1670_v26 }
 0xc03   : > { %v3301_v30 = vpop.eup %3300  ;;  %v3846_v31 = vadd.f32 %v3797_v49, %v1669_v29 }
 0xc04   : > { %v3303_v32 = vpop.eup %3302  ;;  %v1672_v4 = vmul.f32 %v3301_v30, %v3792_v43 }
 0xc05   : > { %2909 = vmatprep.mubr.f32.mxu0 %v3846_v31  ;;  %v1671_v34 = vmul.f32 %v3303_v32, %v3792_v43 }
 0xc06   : > { %2910 = vmatmul.mubr.f32.gmra.mrb[50].mxu0 %v3849_v33  ;;  %v3859_v40 = vadd.f32 %v3797_v49, %v1672_v4 }
 0xc07   : > { %v3305_v35 = vpop.eup %3304  ;;  %v3856_v36 = vadd.f32 %v3797_v49, %v1671_v34 }
 0xc08   : > { %v3307_v39 = vpop.eup %3306  ;;  %v1674_v42 = vmul.f32 %v3305_v35, %v3792_v43 }
 0xc09   : > { %2912 = vmatprep.mubr.f32.mxu0 %v3856_v36  ;;  %v1673_v46 = vmul.f32 %v3307_v39, %v3792_v43 }
 0xc0a   : > { %2913 = vmatmul.mubr.f32.gmra.mrb[52].mxu0 %v3859_v40  ;;  %v3869_v53 = vadd.f32 %v3797_v49, %v1674_v42 }
 0xc0b   : > { %v3309_v47 = vpop.eup %3308  ;;  %v3866_v48 = vadd.f32 %v3797_v49, %v1673_v46 }
 0xc0c   : > { %v3311_v52 = vpop.eup %3310  ;;  %v1676_v54 = vmul.f32 %v3309_v47, %v3792_v43 }
 0xc0d   : > { %2915 = vmatprep.mubr.f32.mxu0 %v3866_v48  ;;  %v1675_v56 = vmul.f32 %v3311_v52, %v3792_v43 }
 0xc0e   : > { %2916 = vmatmul.mubr.f32.gmra.mrb[54].mxu0 %v3869_v53  ;;  %v3879_v58 = vadd.f32 %v3797_v49, %v1676_v54 }
 0xc0f   : > { %v3876_v57 = vadd.f32 %v3797_v49, %v1675_v56  ;;  %v3892_v49 = vld [vmem:[%s4042_s4 + $0x6] ss:$0 sm:$0xff] }
 0xc11   : > { %2918 = vmatprep.mubr.f32.mxu0 %v3876_v57 }
 0xc12   : > { %2919 = vmatmul.mubr.f32.gmra.mrb[56].mxu0 %v3879_v58 }
 0xc14   : > { %v2899_v60 = vpop.f32.mrb[42].mxu0 }
 0xc15   : > { %v1788_v43 = vadd.f32 %v2899_v60, %v3886_v59  ;;  %v1782_v61 = vpop.f32.mrb[43].mxu0 }
 0xc16   : > { %v1783_v41 = vadd.f32 %v3886_v59, %v1782_v61 }
 0xc17   : > { %3312 = vtanh.f32 %v1788_v43 }
 0xc18   : > { %v2902_v62 = vpop.f32.mrb[44].mxu0  ;;  %3314 = vtanh.f32 %v1783_v41 }
 0xc19   : > { %v1792_v63 = vpop.f32.mrb[45].mxu0  ;;  %v1798_v37 = vadd.f32 %v2902_v62, %v3886_v59 }
 0xc1a   : > { %v1793_v38 = vadd.f32 %v3886_v59, %v1792_v63 }
 0xc1b   : > { %3316 = vtanh.f32 %v1798_v37 }
 0xc1c   : > { %v2905_v0 = vpop.f32.mrb[46].mxu0  ;;  %3318 = vtanh.f32 %v1793_v38 }
 0xc1d   : > { %v1802_v1 = vpop.f32.mrb[47].mxu0  ;;  %v1808_v7 = vadd.f32 %v2905_v0, %v3886_v59 }
 0xc1e   : > { %v1803_v45 = vadd.f32 %v3886_v59, %v1802_v1 }
 0xc1f   : > { %3320 = vtanh.f32 %v1808_v7 }
 0xc20   : > { %v2908_v2 = vpop.f32.mrb[48].mxu0  ;;  %3322 = vtanh.f32 %v1803_v45 }
 0xc21   : > { %v3313_v3 = vpop.eup %3312  ;;  %v1812_v5 = vpop.f32.mrb[49].mxu0  ;;  %v1818_v27 = vadd.f32 %v2908_v2, %v3886_v59 }
 0xc22   : > { %v1882_v6 = vmul.f32 %v3313_v3, %v3892_v49  ;;  %v1813_v50 = vadd.f32 %v3886_v59, %v1812_v5  ;;  %v3315_v51 = vpop.eup %3314 }
 0xc23   : > { %3324 = vtanh.f32 %v1818_v27  ;;  %v1881_v9 = vmul.f32 %v3315_v51, %v3892_v49 }
 0xc24   : > { %1899 = vadd.xlane.f32.xlu1 %v1882_v6  ;;  %3326 = vtanh.f32 %v1813_v50 }
 0xc25   : > { %v3317_v8 = vpop.eup %3316  ;;  %1897 = vadd.xlane.f32.xlu0 %v1881_v9 }
 0xc26   : > { %v3319_v10 = vpop.eup %3318  ;;  %v1884_v18 = vmul.f32 %v3317_v8, %v3892_v49 }
 0xc27   : > { %v1883_v19 = vmul.f32 %v3319_v10, %v3892_v49 }
 0xc28   : > { %1903 = vadd.xlane.f32.xlu1 %v1884_v18 }
 0xc29   : > { %v3321_v17 = vpop.eup %3320  ;;  %1901 = vadd.xlane.f32.xlu0 %v1883_v19 }
 0xc2a   : > { %v3323_v20 = vpop.eup %3322  ;;  %v1886_v22 = vmul.f32 %v3321_v17, %v3892_v49 }
 0xc2b   : > { %v1885_v23 = vmul.f32 %v3323_v20, %v3892_v49 }
 0xc2c   : > { %1907 = vadd.xlane.f32.xlu1 %v1886_v22 }
 0xc2d   : > { %v3325_v21 = vpop.eup %3324  ;;  %1905 = vadd.xlane.f32.xlu0 %v1885_v23 }
 0xc2e   : > { %v3327_v24 = vpop.eup %3326  ;;  %v1888_v25 = vmul.f32 %v3325_v21, %v3892_v49 }
 0xc2f   : > { %v1887_v26 = vmul.f32 %v3327_v24, %v3892_v49 }
 0xc30   : > { %1911 = vadd.xlane.f32.xlu1 %v1888_v25 }
 0xc31   : > { %1909 = vadd.xlane.f32.xlu0 %v1887_v26 }
 0xcd9   : > { %v2911_v28 = vpop.f32.mrb[50].mxu0 }
 0xcda   : > { %v1828_v29 = vadd.f32 %v2911_v28, %v3886_v59  ;;  %v1822_v30 = vpop.f32.mrb[51].mxu0 }
 0xcdb   : > { %v1823_v32 = vadd.f32 %v3886_v59, %v1822_v30 }
 0xcdc   : > { %3328 = vtanh.f32 %v1828_v29 }
 0xcdd   : > { %3330 = vtanh.f32 %v1823_v32  ;;  %v2914_v4 = vpop.f32.mrb[52].mxu0 }
 0xcde   : > { %v1838_v34 = vadd.f32 %v2914_v4, %v3886_v59  ;;  %v1832_v35 = vpop.f32.mrb[53].mxu0 }
 0xcdf   : > { %v1833_v39 = vadd.f32 %v3886_v59, %v1832_v35 }
 0xce0   : > { %3332 = vtanh.f32 %v1838_v34 }
 0xce1   : > { %3334 = vtanh.f32 %v1833_v39  ;;  %v2917_v42 = vpop.f32.mrb[54].mxu0 }
 0xce2   : > { %v1848_v46 = vadd.f32 %v2917_v42, %v3886_v59  ;;  %v1842_v47 = vpop.f32.mrb[55].mxu0 }
 0xce3   : > { %v1843_v52 = vadd.f32 %v3886_v59, %v1842_v47 }
 0xce4   : > { %3336 = vtanh.f32 %v1848_v46 }
 0xce5   : > { %3338 = vtanh.f32 %v1843_v52  ;;  %v2920_v54 = vpop.f32.mrb[56].mxu0 }
 0xce6   : > { %v3329_v56 = vpop.eup %3328  ;;  %v1858_v60 = vadd.f32 %v2920_v54, %v3886_v59  ;;  %v1852_v43 = vpop.f32.mrb[57].mxu0 }
 0xce7   : > { %v3331_v61 = vpop.eup %3330  ;;  %v1853_v62 = vadd.f32 %v3886_v59, %v1852_v43  ;;  %v1890_v63 = vmul.f32 %v3329_v56, %v3892_v49 }
 0xce8   : > { %3340 = vtanh.f32 %v1858_v60  ;;  %v1889_v0 = vmul.f32 %v3331_v61, %v3892_v49 }
 0xce9   : > { %3342 = vtanh.f32 %v1853_v62  ;;  %1915 = vadd.xlane.f32.xlu1 %v1890_v63 }
 0xcea   : > { %v3333_v1 = vpop.eup %3332  ;;  %1913 = vadd.xlane.f32.xlu0 %v1889_v0 }
 0xceb   : > { %v3335_v2 = vpop.eup %3334  ;;  %v1892_v3 = vmul.f32 %v3333_v1, %v3892_v49 }
 0xcec   : > { %v1891_v5 = vmul.f32 %v3335_v2, %v3892_v49 }
 0xced   : > { %1919 = vadd.xlane.f32.xlu1 %v1892_v3 }
 0xcee   : > { %v3337_v6 = vpop.eup %3336  ;;  %1917 = vadd.xlane.f32.xlu0 %v1891_v5 }
 0xcef   : > { %v3339_v59 = vpop.eup %3338  ;;  %v1894_v41 = vmul.f32 %v3337_v6, %v3892_v49 }
 0xcf0   : > { %v1893_v37 = vmul.f32 %v3339_v59, %v3892_v49 }
 0xcf1   : > { %1923 = vadd.xlane.f32.xlu1 %v1894_v41 }
 0xcf2   : > { %v3341_v38 = vpop.eup %3340  ;;  %1921 = vadd.xlane.f32.xlu0 %v1893_v37 }
 0xcf3   : > { %v3343_v7 = vpop.eup %3342  ;;  %v1896_v45 = vmul.f32 %v3341_v38, %v3892_v49 }
 0xcf4   : > { %v1895_v27 = vmul.f32 %v3343_v7, %v3892_v49 }
 0xcf5   : > { %1927 = vadd.xlane.f32.xlu1 %v1896_v45 }
 0xcf6   : > { %1925 = vadd.xlane.f32.xlu0 %v1895_v27 }
 0xcf7   : > { %3441 = shalt.err (!%p3438_p8)
}
 0xcf8   : > { %s3442_s11 = scalar_lea.hbm %s3930_s9, 256  ;;  %s3446_s17 = scalar_lea.hbm %s4044_s6, 768 }
 0xcf9   : > { %p3443_p12 = scmp.ne.s32.totalorder %s3930_s9, %s3442_s11  ;;  %p3447_p1 = scmp.lt.u32.totalorder %s3930_s9, %s4044_s6 }
 0xcfa   : > { %p3448_p5 = scmp.lt.u32.totalorder %s3446_s17, %s3442_s11  ;;  %p3450_p9 = scmp.lt.u32.totalorder %s3442_s11, %s3930_s9 }
 0xcfb   : > { %p3444_p0 = pnand %p3443_p12, %p4058_p10 }
 0xcfc   : > { %p3449_p6 = por %p3448_p5, %p3447_p1 }
 0xcfd   : > { %p3445_p2 = pneg %p3444_p0 }
 0xcfe   : > { %p3451_p11 = por %p3450_p9, %p3449_p6 }
 0xd00   : > { %p3452_p13 = pnand %p3451_p11, %p3445_p2 }
 0xd02   : > { %3455 = shalt.err (!%p3452_p13)
}
 0xd03   : > { %s3532_s14 = smov 128   ;;  %s3533_s3 = smov 8   ;;  %v1900_v49 = vpop.xlane.xlu1 %1899  ;;  %v1898_v50 = vpop.xlane.xlu0 %1897 }
 0xd04   : > { %3210 = dma.vmem_to_hbm [thread:$0]  (%p4058_p10), %s3932_s18, 256, %s3930_s9, %s2073_s19, %s3532_s14, %s3532_s14, %s3533_s3  }
 0xd05   : > { %s2280_s18 = sshll.u32 %s3591_s25, 10  ;;  %s2086_s9 = sshll.u32 %s3671_s28, 4  ;;  %s3991_s9 = int_to_ptr.vmem [resolvable:$true] %s2086_s9 }
 0xd06   : > { %s3989_s10 = scalar_lea.hbm %s4043_s5, %s2280_s18  ;;  %s2068_s25 = scalar_lea.sflag [#allocation5], %s3655_s13 }
 0xd07   : > { %v1904_v51 = vpop.xlane.xlu1 %1903  ;;  %v1902_v8 = vpop.xlane.xlu0 %1901  ;;  %s3456_s29 = scalar_lea.vmem %s3991_s9, 1024  ;;  %s3534_s11 = smov [#allocation6]  }
 0xd08   : > { %p3457_p3 = scmp.ne.s32.totalorder %s3991_s9, %s3456_s29  ;;  %s3460_s16 = sshll.u32 %s3534_s11, 4  ;;  %s3461_s16 = int_to_ptr.vmem [resolvable:$false] %s3460_s16 }
 0xd09   : > { %s3462_s15 = scalar_lea.vmem %s3461_s16, 2048  ;;  %p3463_p8 = scmp.lt.s32.totalorder %s3991_s9, %s3461_s16 }
 0xd0a   : > { %p3458_p4 = pnand %p3457_p3, %p4058_p10  ;;  %p3464_p12 = scmp.lt.s32.totalorder %s3462_s15, %s3456_s29 }
 0xd0b   : > { %v1908_v9 = vpop.xlane.xlu1 %1907  ;;  %v1906_v10 = vpop.xlane.xlu0 %1905 }
 0xd0c   : > { %p3459_p7 = pneg %p3458_p4  ;;  %p3465_p0 = por %p3464_p12, %p3463_p8 }
 0xd0e   : > { %p3466_p2 = pnand %p3465_p0, %p3459_p7 }
 0xd0f   : > { %v1912_v17 = vpop.xlane.xlu1 %1911  ;;  %v1910_v18 = vpop.xlane.xlu0 %1909 }
 0xd76   : > { %v1916_v19 = vpop.xlane.xlu1 %1915 }
 0xd77   : > { %v1930_v20 = vmax.f32 %v1900_v49, %v1916_v19  ;;  %v1914_v21 = vpop.xlane.xlu0 %1913 }
 0xd78   : > { %v1929_v22 = vmax.f32 %v1898_v50, %v1914_v21 }
 0xd79   : > { %v1938_v23 = vsub.f32 %v1900_v49, %v1930_v20  ;;  %v1962_v24 = vsub.f32 %v1916_v19, %v1930_v20 }
 0xd7a   : > { %v1937_v25 = vsub.f32 %v1898_v50, %v1929_v22  ;;  %v1961_v26 = vsub.f32 %v1914_v21, %v1929_v22  ;;  %v1920_v28 = vpop.xlane.xlu1 %1919 }
 0xd7b   : > { %v1947_v29 = vmul.f32 1.442695, %v1938_v23  ;;  %v1971_v30 = vmul.f32 1.442695, %v1962_v24  ;;  %v1932_v32 = vmax.f32 %v1904_v51, %v1920_v28  ;;  %v1918_v4 = vpop.xlane.xlu0 %1917 }
 0xd7c   : > { %v1945_v34 = vmul.f32 1.442695, %v1937_v25  ;;  %v1969_v35 = vmul.f32 1.442695, %v1961_v26  ;;  %v1931_v39 = vmax.f32 %v1902_v8, %v1918_v4 }
 0xd7d   : > { %3344 = vpow2.f32 %v1947_v29  ;;  %v1940_v42 = vsub.f32 %v1904_v51, %v1932_v32  ;;  %v1964_v46 = vsub.f32 %v1920_v28, %v1932_v32 }
 0xd7e   : > { %3346 = vpow2.f32 %v1971_v30  ;;  %v1939_v47 = vsub.f32 %v1902_v8, %v1931_v39  ;;  %v1963_v52 = vsub.f32 %v1918_v4, %v1931_v39  ;;  %v1924_v54 = vpop.xlane.xlu1 %1923 }
 0xd7f   : > { %3348 = vpow2.f32 %v1945_v34  ;;  %v1951_v56 = vmul.f32 1.442695, %v1940_v42  ;;  %v1975_v60 = vmul.f32 1.442695, %v1964_v46  ;;  %v1934_v43 = vmax.f32 %v1908_v9, %v1924_v54  ;;  %v1922_v61 = vpop.xlane.xlu0 %1921 }
 0xd80   : > { %3350 = vpow2.f32 %v1969_v35  ;;  %v1949_v62 = vmul.f32 1.442695, %v1939_v47  ;;  %v1973_v63 = vmul.f32 1.442695, %v1963_v52  ;;  %v1933_v0 = vmax.f32 %v1906_v10, %v1922_v61 }
 0xd81   : > { %3352 = vpow2.f32 %v1951_v56  ;;  %v1942_v1 = vsub.f32 %v1908_v9, %v1934_v43  ;;  %v1966_v2 = vsub.f32 %v1924_v54, %v1934_v43 }
 0xd82   : > { %3354 = vpow2.f32 %v1975_v60  ;;  %v1941_v3 = vsub.f32 %v1906_v10, %v1933_v0  ;;  %v1965_v5 = vsub.f32 %v1922_v61, %v1933_v0  ;;  %v1928_v6 = vpop.xlane.xlu1 %1927 }
 0xd83   : > { %3356 = vpow2.f32 %v1949_v62  ;;  %v1955_v59 = vmul.f32 1.442695, %v1942_v1  ;;  %v1979_v41 = vmul.f32 1.442695, %v1966_v2  ;;  %v1936_v37 = vmax.f32 %v1912_v17, %v1928_v6  ;;  %v1926_v38 = vpop.xlane.xlu0 %1925 }
 0xd84   : > { %3358 = vpow2.f32 %v1973_v63  ;;  %v1953_v7 = vmul.f32 1.442695, %v1941_v3  ;;  %v1977_v45 = vmul.f32 1.442695, %v1965_v5  ;;  %v1935_v27 = vmax.f32 %v1910_v18, %v1926_v38 }
 0xd85   : > { %3360 = vpow2.f32 %v1955_v59  ;;  %v1944_v49 = vsub.f32 %v1912_v17, %v1936_v37  ;;  %v1968_v50 = vsub.f32 %v1928_v6, %v1936_v37 }
 0xd86   : > { %3362 = vpow2.f32 %v1979_v41  ;;  %v1943_v51 = vsub.f32 %v1910_v18, %v1935_v27  ;;  %v1967_v8 = vsub.f32 %v1926_v38, %v1935_v27 }
 0xd87   : > { %v3345_v9 = vpop.eup %3344  ;;  %3364 = vpow2.f32 %v1953_v7  ;;  %v1959_v10 = vmul.f32 1.442695, %v1944_v49  ;;  %v1983_v19 = vmul.f32 1.442695, %v1968_v50 }
 0xd88   : > { %v3347_v20 = vpop.eup %3346  ;;  %3366 = vpow2.f32 %v1977_v45  ;;  %v1957_v21 = vmul.f32 1.442695, %v1943_v51  ;;  %v1981_v25 = vmul.f32 1.442695, %v1967_v8 }
 0xd89   : > { %v3349_v22 = vpop.eup %3348  ;;  %v1986_v23 = vadd.f32 %v3347_v20, %v3345_v9  ;;  %3368 = vpow2.f32 %v1959_v10 }
 0xd8a   : > { %v3351_v24 = vpop.eup %3350  ;;  %3370 = vpow2.f32 %v1983_v19 }
 0xd8b   : > { %v3353_v26 = vpop.eup %3352  ;;  %3372 = vrcp.f32 %v1986_v23  ;;  %v1985_v17 = vadd.f32 %v3351_v24, %v3349_v22 }
 0xd8c   : > { %v3355_v28 = vpop.eup %3354  ;;  %3374 = vpow2.f32 %v1957_v21 }
 0xd8d   : > { %v3357_v18 = vpop.eup %3356  ;;  %3376 = vrcp.f32 %v1985_v17  ;;  %v1988_v29 = vadd.f32 %v3355_v28, %v3353_v26 }
 0xd8e   : > { %v3359_v30 = vpop.eup %3358  ;;  %3378 = vpow2.f32 %v1981_v25 }
 0xd8f   : > { %v3361_v32 = vpop.eup %3360  ;;  %3380 = vrcp.f32 %v1988_v29  ;;  %v1987_v4 = vadd.f32 %v3359_v30, %v3357_v18 }
 0xd90   : > { %v3363_v34 = vpop.eup %3362 }
 0xd91   : > { %v3365_v35 = vpop.eup %3364  ;;  %3382 = vrcp.f32 %v1987_v4  ;;  %v1990_v39 = vadd.f32 %v3363_v34, %v3361_v32 }
 0xd92   : > { %v3367_v42 = vpop.eup %3366 }
 0xd93   : > { %v3369_v46 = vpop.eup %3368  ;;  %3384 = vrcp.f32 %v1990_v39  ;;  %v1989_v47 = vadd.f32 %v3367_v42, %v3365_v35 }
 0xd94   : > { %v3371_v52 = vpop.eup %3370 }
 0xd95   : > { %v3373_v54 = vpop.eup %3372  ;;  %3386 = vrcp.f32 %v1989_v47  ;;  %v1992_v56 = vadd.f32 %v3371_v52, %v3369_v46 }
 0xd96   : > { %v3375_v60 = vpop.eup %3374  ;;  %v2010_v43 = vmul.f32 %v3373_v54, %v3345_v9  ;;  %v2026_v61 = vmul.f32 %v3373_v54, %v3347_v20 }
 0xd97   : > { %v3377_v62 = vpop.eup %3376  ;;  %3388 = vrcp.f32 %v1992_v56 }
 0xd98   : > { %v3379_v63 = vpop.eup %3378  ;;  %v2018_v0 = vmul.f32 %v3822_v55, %v2010_v43  ;;  %v2034_v1 = vmul.f32 %v2026_v61, %v3849_v33  ;;  %v2009_v2 = vmul.f32 %v3377_v62, %v3349_v22  ;;  %v2025_v3 = vmul.f32 %v3377_v62, %v3351_v24 }
 0xd99   : > { %v3381_v5 = vpop.eup %3380  ;;  %v1991_v6 = vadd.f32 %v3379_v63, %v3375_v60 }
 0xd9a   : > { %v2042_v59 = vadd.f32 %v2034_v1, %v2018_v0  ;;  %v2017_v41 = vmul.f32 %v3819_v44, %v2009_v2  ;;  %v2033_v37 = vmul.f32 %v2025_v3, %v3846_v31  ;;  %v2012_v38 = vmul.f32 %v3381_v5, %v3353_v26 }
 0xd9b   : > { %v3383_v7 = vpop.eup %3382  ;;  %v2028_v45 = vmul.f32 %v3381_v5, %v3355_v28  ;;  %3390 = vrcp.f32 %v1991_v6 }
 0xd9c   : > { %2050 = vst [vmem:[%s3671_s28 + $0x8] sm:$0xff] %v2042_v59  ;;  %2060 = vst [vmem:[#allocation2 + $0x8] sm:$0xff] %v2042_v59  ;;  %v2041_v27 = vadd.f32 %v2033_v37, %v2017_v41  ;;  %v2020_v55 = vmul.f32 %v3828_v12, %v2012_v38  ;;  %v2011_v33 = vmul.f32 %v3383_v7, %v3357_v18 }
 0xd9d   : > { %v2027_v49 = vmul.f32 %v3383_v7, %v3359_v30  ;;  %v3385_v50 = vpop.eup %3384  ;;  %v2036_v51 = vmul.f32 %v2028_v45, %v3859_v40 }
 0xd9e   : > { %2049 = vst [vmem:[%s3671_s28] sm:$0xff] %v2041_v27  ;;  %2059 = vst [vmem:[#allocation2] sm:$0xff] %v2041_v27  ;;  %v2019_v44 = vmul.f32 %v3825_v11, %v2011_v33  ;;  %v2014_v8 = vmul.f32 %v3385_v50, %v3361_v32  ;;  %v2030_v9 = vmul.f32 %v3385_v50, %v3363_v34 }
 0xd9f   : > { %v2035_v31 = vmul.f32 %v2027_v49, %v3856_v36  ;;  %v3387_v10 = vpop.eup %3386  ;;  %v2044_v19 = vadd.f32 %v2036_v51, %v2020_v55 }
 0xda0   : > { %v2022_v12 = vmul.f32 %v3834_v14, %v2014_v8  ;;  %v2038_v21 = vmul.f32 %v2030_v9, %v3869_v53  ;;  %v2013_v22 = vmul.f32 %v3387_v10, %v3365_v35  ;;  %v2029_v40 = vmul.f32 %v3387_v10, %v3367_v42 }
 0xda1   : > { %v2043_v20 = vadd.f32 %v2035_v31, %v2019_v44  ;;  %v3389_v23 = vpop.eup %3388  ;;  %2052 = vst [vmem:[%s3671_s28 + $0x18] sm:$0xff] %v2044_v19  ;;  %2062 = vst [vmem:[#allocation2 + $0x18] sm:$0xff] %v2044_v19 }
 0xda2   : > { %v2046_v11 = vadd.f32 %v2038_v21, %v2022_v12  ;;  %v2021_v36 = vmul.f32 %v3831_v13, %v2013_v22  ;;  %v2016_v24 = vmul.f32 %v3389_v23, %v3369_v46  ;;  %v2032_v25 = vmul.f32 %v3389_v23, %v3371_v52 }
 0xda3   : > { %2051 = vst [vmem:[%s3671_s28 + $0x10] sm:$0xff] %v2043_v20  ;;  %2061 = vst [vmem:[#allocation2 + $0x10] sm:$0xff] %v2043_v20  ;;  %v2037_v14 = vmul.f32 %v2029_v40, %v3866_v48 }
 0xda4   : > { %2054 = vst [vmem:[%s3671_s28 + $0x28] sm:$0xff] %v2046_v11  ;;  %2064 = vst [vmem:[#allocation2 + $0x28] sm:$0xff] %v2046_v11  ;;  %v2024_v53 = vmul.f32 %v3840_v16, %v2016_v24  ;;  %v2040_v26 = vmul.f32 %v2032_v25, %v3879_v58 }
 0xda5   : > { %v3391_v17 = vpop.eup %3390  ;;  %v2045_v28 = vadd.f32 %v2037_v14, %v2021_v36 }
 0xda6   : > { %v2048_v18 = vadd.f32 %v2040_v26, %v2024_v53  ;;  %v2015_v29 = vmul.f32 %v3391_v17, %v3375_v60  ;;  %v2031_v30 = vmul.f32 %v3391_v17, %v3379_v63 }
 0xda7   : > { %2053 = vst [vmem:[%s3671_s28 + $0x20] sm:$0xff] %v2045_v28  ;;  %2063 = vst [vmem:[#allocation2 + $0x20] sm:$0xff] %v2045_v28 }
 0xda8   : > { %2056 = vst [vmem:[%s3671_s28 + $0x38] sm:$0xff] %v2048_v18  ;;  %2066 = vst [vmem:[#allocation2 + $0x38] sm:$0xff] %v2048_v18  ;;  %v2023_v13 = vmul.f32 %v3837_v15, %v2015_v29  ;;  %v2039_v16 = vmul.f32 %v2031_v30, %v3876_v57 }
 0xdaa   : > { %v2047_v48 = vadd.f32 %v2039_v16, %v2023_v13 }
 0xdac   : > { %2055 = vst [vmem:[%s3671_s28 + $0x30] sm:$0xff] %v2047_v48  ;;  %2065 = vst [vmem:[#allocation2 + $0x30] sm:$0xff] %v2047_v48 }
 0xdad   : > { %3469 = shalt.err (!%p3466_p2)
}
 0xdae   : > { %s3470_s28 = scalar_lea.hbm %s3989_s10, 1024  ;;  %s3474_s26 = scalar_lea.hbm %s4043_s5, 3072 }
 0xdaf   : > { %p3471_p1 = scmp.ne.s32.totalorder %s3989_s10, %s3470_s28  ;;  %p3475_p9 = scmp.lt.u32.totalorder %s3989_s10, %s4043_s5 }
 0xdb0   : > { %p3476_p11 = scmp.lt.u32.totalorder %s3474_s26, %s3470_s28  ;;  %p3478_p3 = scmp.lt.u32.totalorder %s3470_s28, %s3989_s10 }
 0xdb1   : > { %p3472_p5 = pnand %p3471_p1, %p4058_p10 }
 0xdb2   : > { %p3477_p13 = por %p3476_p11, %p3475_p9 }
 0xdb3   : > { %p3473_p6 = pneg %p3472_p5 }
 0xdb4   : > { %p3479_p4 = por %p3478_p3, %p3477_p13 }
 0xdb6   : > { %p3480_p7 = pnand %p3479_p4, %p3473_p6 }
 0xdb8   : > { %3483 = shalt.err (!%p3480_p7)
}
 0xdb9   : > { %3209 = dma.vmem_to_hbm [thread:$0]  (%p4058_p10), %s3991_s9, 1024, %s3989_s10, %s2068_s25, %s3532_s14, %s3532_s14, %s3533_s3  }
 0xdba PF: > { %p3226_p8 = scmp.ge.s32.totalorder %s3526_s24, 2  ;;  %s2117_s20 = sand.u32 1, %s3514_s21  }
 0xdbb   : > { %p4059_p12 = scmp.ne.s32.totalorder %s4050_s8, 0  ;;  %s2118_s29 = scalar_lea.sflag [#allocation5], %s2117_s20 }
 0xdbd   : > { %p3218_p0 = pnand %p3226_p8, %p4059_p12 }
 0xdbf   : > { %3505 = dma.done.wait (!%p3218_p0), %s2118_s29, 1024  }
 0xdc0   : > { %3507 = vsyncadd (!%p3218_p0), %s2118_s29, 4294966272  ;;  %s2127_s7 = scalar_lea.sflag [#allocation8], %s2117_s20 }
 0xdc1   : > { %3509 = dma.done.wait (!%p3218_p0), %s2127_s7, 256  }
 0xdc2   : > { %3511 = vsyncadd (!%p3218_p0), %s2127_s7, 4294967040  ;;  %p21_p10 = scmp.ge.s32.totalorder %s3595_s27, 5   ;;  %s4060_s21 = smov %s3518_s22 }
 0xdc3   : > { %s4061_s22 = smov %s3522_s23  ;;  %s4062_s23 = smov %s3606_s30 }
 0xdc4   : > { %s4063_s24 = smov %s3595_s27  ;;  %23 = sbr.rel (!%p21_p10) target bundleno = 8 (0x8), region = 110 }
 0xdcb   :  { %2132 = vsyncpa [#allocation4], 1 }
 0xdcc   :  { %2134 = vsyncpa [#allocation4 + $0x1], 1 }
 0xdcd   :  { %2135 = vsyncpa [#allocation5], 1 }
 0xdce   :  { %2137 = vsyncpa [#allocation5 + $0x1], 1 }
 0xdcf   :  { %2138 = vsyncpa [#allocation8], 1 }
 0xdd0   :  { %2140 = vsyncpa [#allocation8 + $0x1], 1 }

</bundles_post_ra>
